<compile_context>
chip_gen: v6e
topology: v6e:2x2x1
jax: 0.10.0
libtpu: 0.0.40
codegen_flags: <defaults>
</compile_context>

<pallas_src>
import math
from functools import partial

import jax
import jax.numpy as jnp
from jax import lax
from jax.experimental import pallas as pl
from jax.experimental.pallas import tpu as pltpu


def _resblock_kernel(x_ref, rc_ref, w1_ref, b1_ref, w2_ref, b2_ref, o_ref,
                     *, H, W, C, K):
    pad = K // 2
    HW = H * W

    ii = rc_ref[0:1, :]        # (1, HW) row index of each flattened pixel
    jj = rc_ref[1:2, :]        # (1, HW) col index of each flattened pixel

    # Per-tap (lane-rotation amount, validity mask) pairs, shared by both convolutions.
    taps = []
    for dy in range(K):
        oy = dy - pad
        for dx in range(K):
            ox = dx - pad
            ok = (ii >= -oy) & (ii < H - oy) & (jj >= -ox) & (jj < W - ox)
            taps.append(((-(oy * W + ox)) % HW, ok))

    def conv_same(inp, w_ref):               # inp: (C, HW) f32 -> (C, HW) f32
        acc = jnp.zeros((C, HW), jnp.float32)
        for t, (shift, ok) in enumerate(taps):
            shifted = inp if shift == 0 else pltpu.roll(inp, shift, axis=1)
            tap = jnp.where(ok, shifted, 0.0).astype(jnp.bfloat16)
            # (Cout, Cin) @ (Cin, HW): lane-dense result, bf16 MXU, f32 accumulate.
            # (For large n_feats, stack the K*K taps along the contraction dim instead.)
            acc = acc + jnp.dot(w_ref[t], tap, preferred_element_type=jnp.float32)
        return acc

    x32 = x_ref[0].astype(jnp.float32)                            # (C, HW)
    h = jnp.maximum(conv_same(x32, w1_ref) + b1_ref[...], 0.0)    # conv1 + bias + ReLU
    y = conv_same(h, w2_ref) + b2_ref[...]                        # conv2 (res_scale folded in)
    o_ref[0] = (y + x32).astype(o_ref.dtype)                      # residual add


def resblock_pallas(x_nchw, w1, b1, w2, b2, res_scale=1.0):
    N, C, H, W = x_nchw.shape
    K = w1.shape[0]
    HW = H * W

    # NCHW -> (N, C, H*W): free reshape (no transpose / pad / duplicated residual input).
    x = x_nchw.reshape(N, C, HW).astype(jnp.bfloat16)

    # Tap-major weights, transposed to (Cout, Cin) so each tap is the LHS of a
    # (Cout, Cin) @ (Cin, HW) matmul; res_scale pre-folded into conv2 weights & bias.
    w1t = jnp.transpose(w1, (0, 1, 3, 2)).reshape(K * K, C, C).astype(jnp.bfloat16)
    w2t = (jnp.transpose(w2, (0, 1, 3, 2)).reshape(K * K, C, C)
           * res_scale).astype(jnp.bfloat16)
    b1r = b1.reshape(C, 1).astype(jnp.float32)
    b2r = (b2 * res_scale).reshape(C, 1).astype(jnp.float32)

    # Row/col index of every flattened pixel (for boundary masks; avoids vector int div).
    pix = jnp.arange(HW, dtype=jnp.int32)
    rc = jnp.stack([pix // W, pix % W], axis=0)                   # (2, HW) int32

    kernel = partial(_resblock_kernel, H=H, W=W, C=C, K=K)

    out = pl.pallas_call(
        kernel,
        out_shape=jax.ShapeDtypeStruct((N, C, HW), jnp.float32),
        grid_spec=pltpu.PrefetchScalarGridSpec(
            num_scalar_prefetch=0,
            grid=(N,),
            in_specs=[
                pl.BlockSpec((1, C, HW), lambda b: (b, 0, 0)),      # x (bf16)
                pl.BlockSpec((2, HW), lambda b: (0, 0)),            # row/col ids
                pl.BlockSpec((K * K, C, C), lambda b: (0, 0, 0)),   # w1 taps
                pl.BlockSpec((C, 1), lambda b: (0, 0)),             # b1
                pl.BlockSpec((K * K, C, C), lambda b: (0, 0, 0)),   # w2 taps (scaled)
                pl.BlockSpec((C, 1), lambda b: (0, 0)),             # b2 (scaled)
            ],
            out_specs=pl.BlockSpec((1, C, HW), lambda b: (b, 0, 0)),
        ),
        compiler_params=pltpu.CompilerParams(
            dimension_semantics=("parallel",)),
    )(x, rc, w1t, b1r, w2t, b2r)

    return out.reshape(N, C, H, W)


def resblock_ref(x_nchw, w1, b1, w2, b2, res_scale=1.0):
    """Pure-JAX f32 reference (same semantics as the PyTorch module, NCHW)."""
    def conv(x, w, b):
        w_oihw = jnp.transpose(w, (3, 2, 0, 1))      # (K,K,Cin,Cout) -> OIHW
        y = lax.conv_general_dilated(
            x, w_oihw, window_strides=(1, 1), padding="SAME",
            dimension_numbers=("NCHW", "OIHW", "NCHW"))
        return y + b.reshape(1, -1, 1, 1)

    h = jnp.maximum(conv(x_nchw, w1, b1), 0.0)
    return conv(h, w2, b2) * res_scale + x_nchw


if __name__ == "__main__":
    N, C, H, W, K = 2, 4, 16, 16, 3                  # n_feats=4, kernel_size=3
    res_scale = 1.0                                   # module default

    key = jax.random.PRNGKey(0)
    kx, k1, kb1, k2, kb2 = jax.random.split(key, 5)
    x = jax.random.normal(kx, (N, C, H, W), jnp.float32)

    # Deterministic Conv2d-style init (kaiming_uniform(a=sqrt(5)) => U(-1/sqrt(fan_in), +)).
    fan_in = C * K * K
    bound = 1.0 / math.sqrt(fan_in)
    w1 = jax.random.uniform(k1, (K, K, C, C), jnp.float32, -bound, bound)
    b1 = jax.random.uniform(kb1, (C,), jnp.float32, -bound, bound)
    w2 = jax.random.uniform(k2, (K, K, C, C), jnp.float32, -bound, bound)
    b2 = jax.random.uniform(kb2, (C,), jnp.float32, -bound, bound)

    out = jax.block_until_ready(resblock_pallas(x, w1, b1, w2, b2, res_scale=res_scale))
    ref = resblock_ref(x, w1, b1, w2, b2, res_scale=res_scale)

    assert out.shape == x.shape and out.dtype == jnp.float32
    max_err = float(jnp.max(jnp.abs(out - ref)))
    # Kernel uses bf16 activation/weight operands (f32 accumulation), so compare against
    # the f32 reference with a bf16-appropriate tolerance.
    assert max_err < 5e-2, f"max_err={max_err}"

    print("KERNEL_OK")
</pallas_src>

<mosaic_0001>
module attributes {stable_mosaic.version = 11 : i64} {
  func.func @_resblock_kernel(%arg0: i32, %arg1: memref<1x4x256xbf16, #tpu.memory_space<vmem>>, %arg2: memref<2x256xi32, #tpu.memory_space<vmem>>, %arg3: memref<9x4x4xbf16, #tpu.memory_space<vmem>>, %arg4: memref<4x1xf32, #tpu.memory_space<vmem>>, %arg5: memref<9x4x4xbf16, #tpu.memory_space<vmem>>, %arg6: memref<4x1xf32, #tpu.memory_space<vmem>>, %arg7: memref<1x4x256xf32, #tpu.memory_space<vmem>>) attributes {dimension_semantics = [#tpu.dimension_semantics<parallel>], iteration_bounds = array<i64: 2>, scalar_prefetch = 0 : i64, scratch_operands = 0 : i64, tpu.core_type = #tpu.core_type<tc>, window_params = [{transform_indices = @transform_0, window_bounds = array<i64: 1, 4, 256>}, {pipeline_mode = #tpu.pipeline_mode<synchronous>, transform_indices = @transform_1, window_bounds = array<i64: 2, 256>}, {pipeline_mode = #tpu.pipeline_mode<synchronous>, transform_indices = @transform_2, window_bounds = array<i64: 9, 4, 4>}, {pipeline_mode = #tpu.pipeline_mode<synchronous>, transform_indices = @transform_3, window_bounds = array<i64: 4, 1>}, {pipeline_mode = #tpu.pipeline_mode<synchronous>, transform_indices = @transform_4, window_bounds = array<i64: 9, 4, 4>}, {pipeline_mode = #tpu.pipeline_mode<synchronous>, transform_indices = @transform_5, window_bounds = array<i64: 4, 1>}, {transform_indices = @transform_6, window_bounds = array<i64: 1, 4, 256>}]} {
    %c0 = arith.constant 0 : index
    %c0_0 = arith.constant 0 : index
    %0 = vector.load %arg2[%c0, %c0_0] : memref<2x256xi32, #tpu.memory_space<vmem>>, vector<1x256xi32>
    %c1 = arith.constant 1 : index
    %c0_1 = arith.constant 0 : index
    %1 = vector.load %arg2[%c1, %c0_1] : memref<2x256xi32, #tpu.memory_space<vmem>>, vector<1x256xi32>
    %c1_i32 = arith.constant 1 : i32
    %2 = vector.broadcast %c1_i32 : i32 to vector<1x256xi32>
    %3 = arith.cmpi sge, %0, %2 : vector<1x256xi32>
    %c17_i32 = arith.constant 17 : i32
    %4 = vector.broadcast %c17_i32 : i32 to vector<1x256xi32>
    %5 = arith.cmpi slt, %0, %4 : vector<1x256xi32>
    %6 = arith.andi %3, %5 : vector<1x256xi1>
    %c1_i32_2 = arith.constant 1 : i32
    %7 = vector.broadcast %c1_i32_2 : i32 to vector<1x256xi32>
    %8 = arith.cmpi sge, %1, %7 : vector<1x256xi32>
    %9 = arith.andi %6, %8 : vector<1x256xi1>
    %c17_i32_3 = arith.constant 17 : i32
    %10 = vector.broadcast %c17_i32_3 : i32 to vector<1x256xi32>
    %11 = arith.cmpi slt, %1, %10 : vector<1x256xi32>
    %12 = arith.andi %9, %11 : vector<1x256xi1>
    %c1_i32_4 = arith.constant 1 : i32
    %13 = vector.broadcast %c1_i32_4 : i32 to vector<1x256xi32>
    %14 = arith.cmpi sge, %0, %13 : vector<1x256xi32>
    %c17_i32_5 = arith.constant 17 : i32
    %15 = vector.broadcast %c17_i32_5 : i32 to vector<1x256xi32>
    %16 = arith.cmpi slt, %0, %15 : vector<1x256xi32>
    %17 = arith.andi %14, %16 : vector<1x256xi1>
    %c0_i32 = arith.constant 0 : i32
    %18 = vector.broadcast %c0_i32 : i32 to vector<1x256xi32>
    %19 = arith.cmpi sge, %1, %18 : vector<1x256xi32>
    %20 = arith.andi %17, %19 : vector<1x256xi1>
    %c16_i32 = arith.constant 16 : i32
    %21 = vector.broadcast %c16_i32 : i32 to vector<1x256xi32>
    %22 = arith.cmpi slt, %1, %21 : vector<1x256xi32>
    %23 = arith.andi %20, %22 : vector<1x256xi1>
    %c1_i32_6 = arith.constant 1 : i32
    %24 = vector.broadcast %c1_i32_6 : i32 to vector<1x256xi32>
    %25 = arith.cmpi sge, %0, %24 : vector<1x256xi32>
    %c17_i32_7 = arith.constant 17 : i32
    %26 = vector.broadcast %c17_i32_7 : i32 to vector<1x256xi32>
    %27 = arith.cmpi slt, %0, %26 : vector<1x256xi32>
    %28 = arith.andi %25, %27 : vector<1x256xi1>
    %c-1_i32 = arith.constant -1 : i32
    %29 = vector.broadcast %c-1_i32 : i32 to vector<1x256xi32>
    %30 = arith.cmpi sge, %1, %29 : vector<1x256xi32>
    %31 = arith.andi %28, %30 : vector<1x256xi1>
    %c15_i32 = arith.constant 15 : i32
    %32 = vector.broadcast %c15_i32 : i32 to vector<1x256xi32>
    %33 = arith.cmpi slt, %1, %32 : vector<1x256xi32>
    %34 = arith.andi %31, %33 : vector<1x256xi1>
    %c0_i32_8 = arith.constant 0 : i32
    %35 = vector.broadcast %c0_i32_8 : i32 to vector<1x256xi32>
    %36 = arith.cmpi sge, %0, %35 : vector<1x256xi32>
    %c16_i32_9 = arith.constant 16 : i32
    %37 = vector.broadcast %c16_i32_9 : i32 to vector<1x256xi32>
    %38 = arith.cmpi slt, %0, %37 : vector<1x256xi32>
    %39 = arith.andi %36, %38 : vector<1x256xi1>
    %c1_i32_10 = arith.constant 1 : i32
    %40 = vector.broadcast %c1_i32_10 : i32 to vector<1x256xi32>
    %41 = arith.cmpi sge, %1, %40 : vector<1x256xi32>
    %42 = arith.andi %39, %41 : vector<1x256xi1>
    %c17_i32_11 = arith.constant 17 : i32
    %43 = vector.broadcast %c17_i32_11 : i32 to vector<1x256xi32>
    %44 = arith.cmpi slt, %1, %43 : vector<1x256xi32>
    %45 = arith.andi %42, %44 : vector<1x256xi1>
    %c0_i32_12 = arith.constant 0 : i32
    %46 = vector.broadcast %c0_i32_12 : i32 to vector<1x256xi32>
    %47 = arith.cmpi sge, %0, %46 : vector<1x256xi32>
    %c16_i32_13 = arith.constant 16 : i32
    %48 = vector.broadcast %c16_i32_13 : i32 to vector<1x256xi32>
    %49 = arith.cmpi slt, %0, %48 : vector<1x256xi32>
    %50 = arith.andi %47, %49 : vector<1x256xi1>
    %c0_i32_14 = arith.constant 0 : i32
    %51 = vector.broadcast %c0_i32_14 : i32 to vector<1x256xi32>
    %52 = arith.cmpi sge, %1, %51 : vector<1x256xi32>
    %53 = arith.andi %50, %52 : vector<1x256xi1>
    %c16_i32_15 = arith.constant 16 : i32
    %54 = vector.broadcast %c16_i32_15 : i32 to vector<1x256xi32>
    %55 = arith.cmpi slt, %1, %54 : vector<1x256xi32>
    %56 = arith.andi %53, %55 : vector<1x256xi1>
    %c0_i32_16 = arith.constant 0 : i32
    %57 = vector.broadcast %c0_i32_16 : i32 to vector<1x256xi32>
    %58 = arith.cmpi sge, %0, %57 : vector<1x256xi32>
    %c16_i32_17 = arith.constant 16 : i32
    %59 = vector.broadcast %c16_i32_17 : i32 to vector<1x256xi32>
    %60 = arith.cmpi slt, %0, %59 : vector<1x256xi32>
    %61 = arith.andi %58, %60 : vector<1x256xi1>
    %c-1_i32_18 = arith.constant -1 : i32
    %62 = vector.broadcast %c-1_i32_18 : i32 to vector<1x256xi32>
    %63 = arith.cmpi sge, %1, %62 : vector<1x256xi32>
    %64 = arith.andi %61, %63 : vector<1x256xi1>
    %c15_i32_19 = arith.constant 15 : i32
    %65 = vector.broadcast %c15_i32_19 : i32 to vector<1x256xi32>
    %66 = arith.cmpi slt, %1, %65 : vector<1x256xi32>
    %67 = arith.andi %64, %66 : vector<1x256xi1>
    %c-1_i32_20 = arith.constant -1 : i32
    %68 = vector.broadcast %c-1_i32_20 : i32 to vector<1x256xi32>
    %69 = arith.cmpi sge, %0, %68 : vector<1x256xi32>
    %c15_i32_21 = arith.constant 15 : i32
    %70 = vector.broadcast %c15_i32_21 : i32 to vector<1x256xi32>
    %71 = arith.cmpi slt, %0, %70 : vector<1x256xi32>
    %72 = arith.andi %69, %71 : vector<1x256xi1>
    %c1_i32_22 = arith.constant 1 : i32
    %73 = vector.broadcast %c1_i32_22 : i32 to vector<1x256xi32>
    %74 = arith.cmpi sge, %1, %73 : vector<1x256xi32>
    %75 = arith.andi %72, %74 : vector<1x256xi1>
    %c17_i32_23 = arith.constant 17 : i32
    %76 = vector.broadcast %c17_i32_23 : i32 to vector<1x256xi32>
    %77 = arith.cmpi slt, %1, %76 : vector<1x256xi32>
    %78 = arith.andi %75, %77 : vector<1x256xi1>
    %c-1_i32_24 = arith.constant -1 : i32
    %79 = vector.broadcast %c-1_i32_24 : i32 to vector<1x256xi32>
    %80 = arith.cmpi sge, %0, %79 : vector<1x256xi32>
    %c15_i32_25 = arith.constant 15 : i32
    %81 = vector.broadcast %c15_i32_25 : i32 to vector<1x256xi32>
    %82 = arith.cmpi slt, %0, %81 : vector<1x256xi32>
    %83 = arith.andi %80, %82 : vector<1x256xi1>
    %c0_i32_26 = arith.constant 0 : i32
    %84 = vector.broadcast %c0_i32_26 : i32 to vector<1x256xi32>
    %85 = arith.cmpi sge, %1, %84 : vector<1x256xi32>
    %86 = arith.andi %83, %85 : vector<1x256xi1>
    %c16_i32_27 = arith.constant 16 : i32
    %87 = vector.broadcast %c16_i32_27 : i32 to vector<1x256xi32>
    %88 = arith.cmpi slt, %1, %87 : vector<1x256xi32>
    %89 = arith.andi %86, %88 : vector<1x256xi1>
    %c-1_i32_28 = arith.constant -1 : i32
    %90 = vector.broadcast %c-1_i32_28 : i32 to vector<1x256xi32>
    %91 = arith.cmpi sge, %0, %90 : vector<1x256xi32>
    %c15_i32_29 = arith.constant 15 : i32
    %92 = vector.broadcast %c15_i32_29 : i32 to vector<1x256xi32>
    %93 = arith.cmpi slt, %0, %92 : vector<1x256xi32>
    %94 = arith.andi %91, %93 : vector<1x256xi1>
    %c-1_i32_30 = arith.constant -1 : i32
    %95 = vector.broadcast %c-1_i32_30 : i32 to vector<1x256xi32>
    %96 = arith.cmpi sge, %1, %95 : vector<1x256xi32>
    %97 = arith.andi %94, %96 : vector<1x256xi1>
    %c15_i32_31 = arith.constant 15 : i32
    %98 = vector.broadcast %c15_i32_31 : i32 to vector<1x256xi32>
    %99 = arith.cmpi slt, %1, %98 : vector<1x256xi32>
    %100 = arith.andi %97, %99 : vector<1x256xi1>
    %c0_32 = arith.constant 0 : index
    %c0_33 = arith.constant 0 : index
    %c0_34 = arith.constant 0 : index
    %101 = vector.load %arg1[%c0_32, %c0_33, %c0_34] : memref<1x4x256xbf16, #tpu.memory_space<vmem>>, vector<1x4x256xbf16>
    %102 = vector.shape_cast %101 : vector<1x4x256xbf16> to vector<4x256xbf16>
    %103 = arith.extf %102 : vector<4x256xbf16> to vector<4x256xf32>
    %cst = arith.constant 0.000000e+00 : f32
    %104 = vector.broadcast %cst : f32 to vector<4x256xf32>
    %c17_i32_35 = arith.constant 17 : i32
    %105 = tpu.dynamic_rotate %103 by %c17_i32_35 dim 1 : vector<4x256xf32>, i32 -> vector<4x256xf32>
    %cst_36 = arith.constant 0.000000e+00 : f32
    %106 = vector.shape_cast %12 : vector<1x256xi1> to vector<1x256xi1>
    %107 = vector.broadcast %106 : vector<1x256xi1> to vector<4x256xi1>
    %108 = vector.broadcast %cst_36 : f32 to vector<4x256xf32>
    %109 = arith.select %107, %105, %108 : vector<4x256xi1>, vector<4x256xf32>
    %110 = arith.truncf %109 : vector<4x256xf32> to vector<4x256xbf16>
    %c0_37 = arith.constant 0 : index
    %c0_38 = arith.constant 0 : index
    %c0_39 = arith.constant 0 : index
    %111 = vector.load %arg3[%c0_37, %c0_38, %c0_39] : memref<9x4x4xbf16, #tpu.memory_space<vmem>>, vector<1x4x4xbf16>
    %112 = vector.shape_cast %111 : vector<1x4x4xbf16> to vector<4x4xbf16>
    %cst_40 = arith.constant dense<0.000000e+00> : vector<4x256xf32>
    %113 = tpu.matmul %112, %110, %cst_40 {dimension_numbers = #tpu.dot_dimension_numbers<[1], [0], [0], [1], [0, 0, 1, 1], [], []>} : vector<4x4xbf16>, vector<4x256xbf16>, vector<4x256xf32> -> vector<4x256xf32>
    %114 = arith.addf %104, %113 : vector<4x256xf32>
    %c16_i32_41 = arith.constant 16 : i32
    %115 = tpu.dynamic_rotate %103 by %c16_i32_41 dim 1 : vector<4x256xf32>, i32 -> vector<4x256xf32>
    %cst_42 = arith.constant 0.000000e+00 : f32
    %116 = vector.shape_cast %23 : vector<1x256xi1> to vector<1x256xi1>
    %117 = vector.broadcast %116 : vector<1x256xi1> to vector<4x256xi1>
    %118 = vector.broadcast %cst_42 : f32 to vector<4x256xf32>
    %119 = arith.select %117, %115, %118 : vector<4x256xi1>, vector<4x256xf32>
    %120 = arith.truncf %119 : vector<4x256xf32> to vector<4x256xbf16>
    %c1_43 = arith.constant 1 : index
    %c0_44 = arith.constant 0 : index
    %c0_45 = arith.constant 0 : index
    %121 = vector.load %arg3[%c1_43, %c0_44, %c0_45] : memref<9x4x4xbf16, #tpu.memory_space<vmem>>, vector<1x4x4xbf16>
    %122 = vector.shape_cast %121 : vector<1x4x4xbf16> to vector<4x4xbf16>
    %cst_46 = arith.constant dense<0.000000e+00> : vector<4x256xf32>
    %123 = tpu.matmul %122, %120, %cst_46 {dimension_numbers = #tpu.dot_dimension_numbers<[1], [0], [0], [1], [0, 0, 1, 1], [], []>} : vector<4x4xbf16>, vector<4x256xbf16>, vector<4x256xf32> -> vector<4x256xf32>
    %124 = arith.addf %114, %123 : vector<4x256xf32>
    %c15_i32_47 = arith.constant 15 : i32
    %125 = tpu.dynamic_rotate %103 by %c15_i32_47 dim 1 : vector<4x256xf32>, i32 -> vector<4x256xf32>
    %cst_48 = arith.constant 0.000000e+00 : f32
    %126 = vector.shape_cast %34 : vector<1x256xi1> to vector<1x256xi1>
    %127 = vector.broadcast %126 : vector<1x256xi1> to vector<4x256xi1>
    %128 = vector.broadcast %cst_48 : f32 to vector<4x256xf32>
    %129 = arith.select %127, %125, %128 : vector<4x256xi1>, vector<4x256xf32>
    %130 = arith.truncf %129 : vector<4x256xf32> to vector<4x256xbf16>
    %c2 = arith.constant 2 : index
    %c0_49 = arith.constant 0 : index
    %c0_50 = arith.constant 0 : index
    %131 = vector.load %arg3[%c2, %c0_49, %c0_50] : memref<9x4x4xbf16, #tpu.memory_space<vmem>>, vector<1x4x4xbf16>
    %132 = vector.shape_cast %131 : vector<1x4x4xbf16> to vector<4x4xbf16>
    %cst_51 = arith.constant dense<0.000000e+00> : vector<4x256xf32>
    %133 = tpu.matmul %132, %130, %cst_51 {dimension_numbers = #tpu.dot_dimension_numbers<[1], [0], [0], [1], [0, 0, 1, 1], [], []>} : vector<4x4xbf16>, vector<4x256xbf16>, vector<4x256xf32> -> vector<4x256xf32>
    %134 = arith.addf %124, %133 : vector<4x256xf32>
    %c1_i32_52 = arith.constant 1 : i32
    %135 = tpu.dynamic_rotate %103 by %c1_i32_52 dim 1 : vector<4x256xf32>, i32 -> vector<4x256xf32>
    %cst_53 = arith.constant 0.000000e+00 : f32
    %136 = vector.shape_cast %45 : vector<1x256xi1> to vector<1x256xi1>
    %137 = vector.broadcast %136 : vector<1x256xi1> to vector<4x256xi1>
    %138 = vector.broadcast %cst_53 : f32 to vector<4x256xf32>
    %139 = arith.select %137, %135, %138 : vector<4x256xi1>, vector<4x256xf32>
    %140 = arith.truncf %139 : vector<4x256xf32> to vector<4x256xbf16>
    %c3 = arith.constant 3 : index
    %c0_54 = arith.constant 0 : index
    %c0_55 = arith.constant 0 : index
    %141 = vector.load %arg3[%c3, %c0_54, %c0_55] : memref<9x4x4xbf16, #tpu.memory_space<vmem>>, vector<1x4x4xbf16>
    %142 = vector.shape_cast %141 : vector<1x4x4xbf16> to vector<4x4xbf16>
    %cst_56 = arith.constant dense<0.000000e+00> : vector<4x256xf32>
    %143 = tpu.matmul %142, %140, %cst_56 {dimension_numbers = #tpu.dot_dimension_numbers<[1], [0], [0], [1], [0, 0, 1, 1], [], []>} : vector<4x4xbf16>, vector<4x256xbf16>, vector<4x256xf32> -> vector<4x256xf32>
    %144 = arith.addf %134, %143 : vector<4x256xf32>
    %cst_57 = arith.constant 0.000000e+00 : f32
    %145 = vector.shape_cast %56 : vector<1x256xi1> to vector<1x256xi1>
    %146 = vector.broadcast %145 : vector<1x256xi1> to vector<4x256xi1>
    %147 = vector.broadcast %cst_57 : f32 to vector<4x256xf32>
    %148 = arith.select %146, %103, %147 : vector<4x256xi1>, vector<4x256xf32>
    %149 = arith.truncf %148 : vector<4x256xf32> to vector<4x256xbf16>
    %c4 = arith.constant 4 : index
    %c0_58 = arith.constant 0 : index
    %c0_59 = arith.constant 0 : index
    %150 = vector.load %arg3[%c4, %c0_58, %c0_59] : memref<9x4x4xbf16, #tpu.memory_space<vmem>>, vector<1x4x4xbf16>
    %151 = vector.shape_cast %150 : vector<1x4x4xbf16> to vector<4x4xbf16>
    %cst_60 = arith.constant dense<0.000000e+00> : vector<4x256xf32>
    %152 = tpu.matmul %151, %149, %cst_60 {dimension_numbers = #tpu.dot_dimension_numbers<[1], [0], [0], [1], [0, 0, 1, 1], [], []>} : vector<4x4xbf16>, vector<4x256xbf16>, vector<4x256xf32> -> vector<4x256xf32>
    %153 = arith.addf %144, %152 : vector<4x256xf32>
    %c255_i32 = arith.constant 255 : i32
    %154 = tpu.dynamic_rotate %103 by %c255_i32 dim 1 : vector<4x256xf32>, i32 -> vector<4x256xf32>
    %cst_61 = arith.constant 0.000000e+00 : f32
    %155 = vector.shape_cast %67 : vector<1x256xi1> to vector<1x256xi1>
    %156 = vector.broadcast %155 : vector<1x256xi1> to vector<4x256xi1>
    %157 = vector.broadcast %cst_61 : f32 to vector<4x256xf32>
    %158 = arith.select %156, %154, %157 : vector<4x256xi1>, vector<4x256xf32>
    %159 = arith.truncf %158 : vector<4x256xf32> to vector<4x256xbf16>
    %c5 = arith.constant 5 : index
    %c0_62 = arith.constant 0 : index
    %c0_63 = arith.constant 0 : index
    %160 = vector.load %arg3[%c5, %c0_62, %c0_63] : memref<9x4x4xbf16, #tpu.memory_space<vmem>>, vector<1x4x4xbf16>
    %161 = vector.shape_cast %160 : vector<1x4x4xbf16> to vector<4x4xbf16>
    %cst_64 = arith.constant dense<0.000000e+00> : vector<4x256xf32>
    %162 = tpu.matmul %161, %159, %cst_64 {dimension_numbers = #tpu.dot_dimension_numbers<[1], [0], [0], [1], [0, 0, 1, 1], [], []>} : vector<4x4xbf16>, vector<4x256xbf16>, vector<4x256xf32> -> vector<4x256xf32>
    %163 = arith.addf %153, %162 : vector<4x256xf32>
    %c241_i32 = arith.constant 241 : i32
    %164 = tpu.dynamic_rotate %103 by %c241_i32 dim 1 : vector<4x256xf32>, i32 -> vector<4x256xf32>
    %cst_65 = arith.constant 0.000000e+00 : f32
    %165 = vector.shape_cast %78 : vector<1x256xi1> to vector<1x256xi1>
    %166 = vector.broadcast %165 : vector<1x256xi1> to vector<4x256xi1>
    %167 = vector.broadcast %cst_65 : f32 to vector<4x256xf32>
    %168 = arith.select %166, %164, %167 : vector<4x256xi1>, vector<4x256xf32>
    %169 = arith.truncf %168 : vector<4x256xf32> to vector<4x256xbf16>
    %c6 = arith.constant 6 : index
    %c0_66 = arith.constant 0 : index
    %c0_67 = arith.constant 0 : index
    %170 = vector.load %arg3[%c6, %c0_66, %c0_67] : memref<9x4x4xbf16, #tpu.memory_space<vmem>>, vector<1x4x4xbf16>
    %171 = vector.shape_cast %170 : vector<1x4x4xbf16> to vector<4x4xbf16>
    %cst_68 = arith.constant dense<0.000000e+00> : vector<4x256xf32>
    %172 = tpu.matmul %171, %169, %cst_68 {dimension_numbers = #tpu.dot_dimension_numbers<[1], [0], [0], [1], [0, 0, 1, 1], [], []>} : vector<4x4xbf16>, vector<4x256xbf16>, vector<4x256xf32> -> vector<4x256xf32>
    %173 = arith.addf %163, %172 : vector<4x256xf32>
    %c240_i32 = arith.constant 240 : i32
    %174 = tpu.dynamic_rotate %103 by %c240_i32 dim 1 : vector<4x256xf32>, i32 -> vector<4x256xf32>
    %cst_69 = arith.constant 0.000000e+00 : f32
    %175 = vector.shape_cast %89 : vector<1x256xi1> to vector<1x256xi1>
    %176 = vector.broadcast %175 : vector<1x256xi1> to vector<4x256xi1>
    %177 = vector.broadcast %cst_69 : f32 to vector<4x256xf32>
    %178 = arith.select %176, %174, %177 : vector<4x256xi1>, vector<4x256xf32>
    %179 = arith.truncf %178 : vector<4x256xf32> to vector<4x256xbf16>
    %c7 = arith.constant 7 : index
    %c0_70 = arith.constant 0 : index
    %c0_71 = arith.constant 0 : index
    %180 = vector.load %arg3[%c7, %c0_70, %c0_71] : memref<9x4x4xbf16, #tpu.memory_space<vmem>>, vector<1x4x4xbf16>
    %181 = vector.shape_cast %180 : vector<1x4x4xbf16> to vector<4x4xbf16>
    %cst_72 = arith.constant dense<0.000000e+00> : vector<4x256xf32>
    %182 = tpu.matmul %181, %179, %cst_72 {dimension_numbers = #tpu.dot_dimension_numbers<[1], [0], [0], [1], [0, 0, 1, 1], [], []>} : vector<4x4xbf16>, vector<4x256xbf16>, vector<4x256xf32> -> vector<4x256xf32>
    %183 = arith.addf %173, %182 : vector<4x256xf32>
    %c239_i32 = arith.constant 239 : i32
    %184 = tpu.dynamic_rotate %103 by %c239_i32 dim 1 : vector<4x256xf32>, i32 -> vector<4x256xf32>
    %cst_73 = arith.constant 0.000000e+00 : f32
    %185 = vector.shape_cast %100 : vector<1x256xi1> to vector<1x256xi1>
    %186 = vector.broadcast %185 : vector<1x256xi1> to vector<4x256xi1>
    %187 = vector.broadcast %cst_73 : f32 to vector<4x256xf32>
    %188 = arith.select %186, %184, %187 : vector<4x256xi1>, vector<4x256xf32>
    %189 = arith.truncf %188 : vector<4x256xf32> to vector<4x256xbf16>
    %c8 = arith.constant 8 : index
    %c0_74 = arith.constant 0 : index
    %c0_75 = arith.constant 0 : index
    %190 = vector.load %arg3[%c8, %c0_74, %c0_75] : memref<9x4x4xbf16, #tpu.memory_space<vmem>>, vector<1x4x4xbf16>
    %191 = vector.shape_cast %190 : vector<1x4x4xbf16> to vector<4x4xbf16>
    %cst_76 = arith.constant dense<0.000000e+00> : vector<4x256xf32>
    %192 = tpu.matmul %191, %189, %cst_76 {dimension_numbers = #tpu.dot_dimension_numbers<[1], [0], [0], [1], [0, 0, 1, 1], [], []>} : vector<4x4xbf16>, vector<4x256xbf16>, vector<4x256xf32> -> vector<4x256xf32>
    %193 = arith.addf %183, %192 : vector<4x256xf32>
    %c0_77 = arith.constant 0 : index
    %c0_78 = arith.constant 0 : index
    %194 = vector.load %arg4[%c0_77, %c0_78] : memref<4x1xf32, #tpu.memory_space<vmem>>, vector<4x1xf32>
    %195 = vector.broadcast %194 : vector<4x1xf32> to vector<4x256xf32>
    %196 = arith.addf %193, %195 : vector<4x256xf32>
    %cst_79 = arith.constant 0.000000e+00 : f32
    %197 = vector.broadcast %cst_79 : f32 to vector<4x256xf32>
    %198 = arith.maximumf %196, %197 : vector<4x256xf32>
    %cst_80 = arith.constant 0.000000e+00 : f32
    %199 = vector.broadcast %cst_80 : f32 to vector<4x256xf32>
    %c17_i32_81 = arith.constant 17 : i32
    %200 = tpu.dynamic_rotate %198 by %c17_i32_81 dim 1 : vector<4x256xf32>, i32 -> vector<4x256xf32>
    %cst_82 = arith.constant 0.000000e+00 : f32
    %201 = vector.shape_cast %12 : vector<1x256xi1> to vector<1x256xi1>
    %202 = vector.broadcast %201 : vector<1x256xi1> to vector<4x256xi1>
    %203 = vector.broadcast %cst_82 : f32 to vector<4x256xf32>
    %204 = arith.select %202, %200, %203 : vector<4x256xi1>, vector<4x256xf32>
    %205 = arith.truncf %204 : vector<4x256xf32> to vector<4x256xbf16>
    %c0_83 = arith.constant 0 : index
    %c0_84 = arith.constant 0 : index
    %c0_85 = arith.constant 0 : index
    %206 = vector.load %arg5[%c0_83, %c0_84, %c0_85] : memref<9x4x4xbf16, #tpu.memory_space<vmem>>, vector<1x4x4xbf16>
    %207 = vector.shape_cast %206 : vector<1x4x4xbf16> to vector<4x4xbf16>
    %cst_86 = arith.constant dense<0.000000e+00> : vector<4x256xf32>
    %208 = tpu.matmul %207, %205, %cst_86 {dimension_numbers = #tpu.dot_dimension_numbers<[1], [0], [0], [1], [0, 0, 1, 1], [], []>} : vector<4x4xbf16>, vector<4x256xbf16>, vector<4x256xf32> -> vector<4x256xf32>
    %209 = arith.addf %199, %208 : vector<4x256xf32>
    %c16_i32_87 = arith.constant 16 : i32
    %210 = tpu.dynamic_rotate %198 by %c16_i32_87 dim 1 : vector<4x256xf32>, i32 -> vector<4x256xf32>
    %cst_88 = arith.constant 0.000000e+00 : f32
    %211 = vector.shape_cast %23 : vector<1x256xi1> to vector<1x256xi1>
    %212 = vector.broadcast %211 : vector<1x256xi1> to vector<4x256xi1>
    %213 = vector.broadcast %cst_88 : f32 to vector<4x256xf32>
    %214 = arith.select %212, %210, %213 : vector<4x256xi1>, vector<4x256xf32>
    %215 = arith.truncf %214 : vector<4x256xf32> to vector<4x256xbf16>
    %c1_89 = arith.constant 1 : index
    %c0_90 = arith.constant 0 : index
    %c0_91 = arith.constant 0 : index
    %216 = vector.load %arg5[%c1_89, %c0_90, %c0_91] : memref<9x4x4xbf16, #tpu.memory_space<vmem>>, vector<1x4x4xbf16>
    %217 = vector.shape_cast %216 : vector<1x4x4xbf16> to vector<4x4xbf16>
    %cst_92 = arith.constant dense<0.000000e+00> : vector<4x256xf32>
    %218 = tpu.matmul %217, %215, %cst_92 {dimension_numbers = #tpu.dot_dimension_numbers<[1], [0], [0], [1], [0, 0, 1, 1], [], []>} : vector<4x4xbf16>, vector<4x256xbf16>, vector<4x256xf32> -> vector<4x256xf32>
    %219 = arith.addf %209, %218 : vector<4x256xf32>
    %c15_i32_93 = arith.constant 15 : i32
    %220 = tpu.dynamic_rotate %198 by %c15_i32_93 dim 1 : vector<4x256xf32>, i32 -> vector<4x256xf32>
    %cst_94 = arith.constant 0.000000e+00 : f32
    %221 = vector.shape_cast %34 : vector<1x256xi1> to vector<1x256xi1>
    %222 = vector.broadcast %221 : vector<1x256xi1> to vector<4x256xi1>
    %223 = vector.broadcast %cst_94 : f32 to vector<4x256xf32>
    %224 = arith.select %222, %220, %223 : vector<4x256xi1>, vector<4x256xf32>
    %225 = arith.truncf %224 : vector<4x256xf32> to vector<4x256xbf16>
    %c2_95 = arith.constant 2 : index
    %c0_96 = arith.constant 0 : index
    %c0_97 = arith.constant 0 : index
    %226 = vector.load %arg5[%c2_95, %c0_96, %c0_97] : memref<9x4x4xbf16, #tpu.memory_space<vmem>>, vector<1x4x4xbf16>
    %227 = vector.shape_cast %226 : vector<1x4x4xbf16> to vector<4x4xbf16>
    %cst_98 = arith.constant dense<0.000000e+00> : vector<4x256xf32>
    %228 = tpu.matmul %227, %225, %cst_98 {dimension_numbers = #tpu.dot_dimension_numbers<[1], [0], [0], [1], [0, 0, 1, 1], [], []>} : vector<4x4xbf16>, vector<4x256xbf16>, vector<4x256xf32> -> vector<4x256xf32>
    %229 = arith.addf %219, %228 : vector<4x256xf32>
    %c1_i32_99 = arith.constant 1 : i32
    %230 = tpu.dynamic_rotate %198 by %c1_i32_99 dim 1 : vector<4x256xf32>, i32 -> vector<4x256xf32>
    %cst_100 = arith.constant 0.000000e+00 : f32
    %231 = vector.shape_cast %45 : vector<1x256xi1> to vector<1x256xi1>
    %232 = vector.broadcast %231 : vector<1x256xi1> to vector<4x256xi1>
    %233 = vector.broadcast %cst_100 : f32 to vector<4x256xf32>
    %234 = arith.select %232, %230, %233 : vector<4x256xi1>, vector<4x256xf32>
    %235 = arith.truncf %234 : vector<4x256xf32> to vector<4x256xbf16>
    %c3_101 = arith.constant 3 : index
    %c0_102 = arith.constant 0 : index
    %c0_103 = arith.constant 0 : index
    %236 = vector.load %arg5[%c3_101, %c0_102, %c0_103] : memref<9x4x4xbf16, #tpu.memory_space<vmem>>, vector<1x4x4xbf16>
    %237 = vector.shape_cast %236 : vector<1x4x4xbf16> to vector<4x4xbf16>
    %cst_104 = arith.constant dense<0.000000e+00> : vector<4x256xf32>
    %238 = tpu.matmul %237, %235, %cst_104 {dimension_numbers = #tpu.dot_dimension_numbers<[1], [0], [0], [1], [0, 0, 1, 1], [], []>} : vector<4x4xbf16>, vector<4x256xbf16>, vector<4x256xf32> -> vector<4x256xf32>
    %239 = arith.addf %229, %238 : vector<4x256xf32>
    %cst_105 = arith.constant 0.000000e+00 : f32
    %240 = vector.shape_cast %56 : vector<1x256xi1> to vector<1x256xi1>
    %241 = vector.broadcast %240 : vector<1x256xi1> to vector<4x256xi1>
    %242 = vector.broadcast %cst_105 : f32 to vector<4x256xf32>
    %243 = arith.select %241, %198, %242 : vector<4x256xi1>, vector<4x256xf32>
    %244 = arith.truncf %243 : vector<4x256xf32> to vector<4x256xbf16>
    %c4_106 = arith.constant 4 : index
    %c0_107 = arith.constant 0 : index
    %c0_108 = arith.constant 0 : index
    %245 = vector.load %arg5[%c4_106, %c0_107, %c0_108] : memref<9x4x4xbf16, #tpu.memory_space<vmem>>, vector<1x4x4xbf16>
    %246 = vector.shape_cast %245 : vector<1x4x4xbf16> to vector<4x4xbf16>
    %cst_109 = arith.constant dense<0.000000e+00> : vector<4x256xf32>
    %247 = tpu.matmul %246, %244, %cst_109 {dimension_numbers = #tpu.dot_dimension_numbers<[1], [0], [0], [1], [0, 0, 1, 1], [], []>} : vector<4x4xbf16>, vector<4x256xbf16>, vector<4x256xf32> -> vector<4x256xf32>
    %248 = arith.addf %239, %247 : vector<4x256xf32>
    %c255_i32_110 = arith.constant 255 : i32
    %249 = tpu.dynamic_rotate %198 by %c255_i32_110 dim 1 : vector<4x256xf32>, i32 -> vector<4x256xf32>
    %cst_111 = arith.constant 0.000000e+00 : f32
    %250 = vector.shape_cast %67 : vector<1x256xi1> to vector<1x256xi1>
    %251 = vector.broadcast %250 : vector<1x256xi1> to vector<4x256xi1>
    %252 = vector.broadcast %cst_111 : f32 to vector<4x256xf32>
    %253 = arith.select %251, %249, %252 : vector<4x256xi1>, vector<4x256xf32>
    %254 = arith.truncf %253 : vector<4x256xf32> to vector<4x256xbf16>
    %c5_112 = arith.constant 5 : index
    %c0_113 = arith.constant 0 : index
    %c0_114 = arith.constant 0 : index
    %255 = vector.load %arg5[%c5_112, %c0_113, %c0_114] : memref<9x4x4xbf16, #tpu.memory_space<vmem>>, vector<1x4x4xbf16>
    %256 = vector.shape_cast %255 : vector<1x4x4xbf16> to vector<4x4xbf16>
    %cst_115 = arith.constant dense<0.000000e+00> : vector<4x256xf32>
    %257 = tpu.matmul %256, %254, %cst_115 {dimension_numbers = #tpu.dot_dimension_numbers<[1], [0], [0], [1], [0, 0, 1, 1], [], []>} : vector<4x4xbf16>, vector<4x256xbf16>, vector<4x256xf32> -> vector<4x256xf32>
    %258 = arith.addf %248, %257 : vector<4x256xf32>
    %c241_i32_116 = arith.constant 241 : i32
    %259 = tpu.dynamic_rotate %198 by %c241_i32_116 dim 1 : vector<4x256xf32>, i32 -> vector<4x256xf32>
    %cst_117 = arith.constant 0.000000e+00 : f32
    %260 = vector.shape_cast %78 : vector<1x256xi1> to vector<1x256xi1>
    %261 = vector.broadcast %260 : vector<1x256xi1> to vector<4x256xi1>
    %262 = vector.broadcast %cst_117 : f32 to vector<4x256xf32>
    %263 = arith.select %261, %259, %262 : vector<4x256xi1>, vector<4x256xf32>
    %264 = arith.truncf %263 : vector<4x256xf32> to vector<4x256xbf16>
    %c6_118 = arith.constant 6 : index
    %c0_119 = arith.constant 0 : index
    %c0_120 = arith.constant 0 : index
    %265 = vector.load %arg5[%c6_118, %c0_119, %c0_120] : memref<9x4x4xbf16, #tpu.memory_space<vmem>>, vector<1x4x4xbf16>
    %266 = vector.shape_cast %265 : vector<1x4x4xbf16> to vector<4x4xbf16>
    %cst_121 = arith.constant dense<0.000000e+00> : vector<4x256xf32>
    %267 = tpu.matmul %266, %264, %cst_121 {dimension_numbers = #tpu.dot_dimension_numbers<[1], [0], [0], [1], [0, 0, 1, 1], [], []>} : vector<4x4xbf16>, vector<4x256xbf16>, vector<4x256xf32> -> vector<4x256xf32>
    %268 = arith.addf %258, %267 : vector<4x256xf32>
    %c240_i32_122 = arith.constant 240 : i32
    %269 = tpu.dynamic_rotate %198 by %c240_i32_122 dim 1 : vector<4x256xf32>, i32 -> vector<4x256xf32>
    %cst_123 = arith.constant 0.000000e+00 : f32
    %270 = vector.shape_cast %89 : vector<1x256xi1> to vector<1x256xi1>
    %271 = vector.broadcast %270 : vector<1x256xi1> to vector<4x256xi1>
    %272 = vector.broadcast %cst_123 : f32 to vector<4x256xf32>
    %273 = arith.select %271, %269, %272 : vector<4x256xi1>, vector<4x256xf32>
    %274 = arith.truncf %273 : vector<4x256xf32> to vector<4x256xbf16>
    %c7_124 = arith.constant 7 : index
    %c0_125 = arith.constant 0 : index
    %c0_126 = arith.constant 0 : index
    %275 = vector.load %arg5[%c7_124, %c0_125, %c0_126] : memref<9x4x4xbf16, #tpu.memory_space<vmem>>, vector<1x4x4xbf16>
    %276 = vector.shape_cast %275 : vector<1x4x4xbf16> to vector<4x4xbf16>
    %cst_127 = arith.constant dense<0.000000e+00> : vector<4x256xf32>
    %277 = tpu.matmul %276, %274, %cst_127 {dimension_numbers = #tpu.dot_dimension_numbers<[1], [0], [0], [1], [0, 0, 1, 1], [], []>} : vector<4x4xbf16>, vector<4x256xbf16>, vector<4x256xf32> -> vector<4x256xf32>
    %278 = arith.addf %268, %277 : vector<4x256xf32>
    %c239_i32_128 = arith.constant 239 : i32
    %279 = tpu.dynamic_rotate %198 by %c239_i32_128 dim 1 : vector<4x256xf32>, i32 -> vector<4x256xf32>
    %cst_129 = arith.constant 0.000000e+00 : f32
    %280 = vector.shape_cast %100 : vector<1x256xi1> to vector<1x256xi1>
    %281 = vector.broadcast %280 : vector<1x256xi1> to vector<4x256xi1>
    %282 = vector.broadcast %cst_129 : f32 to vector<4x256xf32>
    %283 = arith.select %281, %279, %282 : vector<4x256xi1>, vector<4x256xf32>
    %284 = arith.truncf %283 : vector<4x256xf32> to vector<4x256xbf16>
    %c8_130 = arith.constant 8 : index
    %c0_131 = arith.constant 0 : index
    %c0_132 = arith.constant 0 : index
    %285 = vector.load %arg5[%c8_130, %c0_131, %c0_132] : memref<9x4x4xbf16, #tpu.memory_space<vmem>>, vector<1x4x4xbf16>
    %286 = vector.shape_cast %285 : vector<1x4x4xbf16> to vector<4x4xbf16>
    %cst_133 = arith.constant dense<0.000000e+00> : vector<4x256xf32>
    %287 = tpu.matmul %286, %284, %cst_133 {dimension_numbers = #tpu.dot_dimension_numbers<[1], [0], [0], [1], [0, 0, 1, 1], [], []>} : vector<4x4xbf16>, vector<4x256xbf16>, vector<4x256xf32> -> vector<4x256xf32>
    %288 = arith.addf %278, %287 : vector<4x256xf32>
    %c0_134 = arith.constant 0 : index
    %c0_135 = arith.constant 0 : index
    %289 = vector.load %arg6[%c0_134, %c0_135] : memref<4x1xf32, #tpu.memory_space<vmem>>, vector<4x1xf32>
    %290 = vector.broadcast %289 : vector<4x1xf32> to vector<4x256xf32>
    %291 = arith.addf %288, %290 : vector<4x256xf32>
    %292 = arith.addf %291, %103 : vector<4x256xf32>
    %c0_136 = arith.constant 0 : index
    %c0_137 = arith.constant 0 : index
    %c0_138 = arith.constant 0 : index
    %293 = vector.load %arg7[%c0_136, %c0_137, %c0_138] : memref<1x4x256xf32, #tpu.memory_space<vmem>>, vector<1x4x256xf32>
    %294 = vector.shape_cast %293 : vector<1x4x256xf32> to vector<4x256xf32>
    %295 = vector.shape_cast %292 : vector<4x256xf32> to vector<1x4x256xf32>
    tpu.vector_store %arg7[%c0_136, %c0_137, %c0_138], %295 {strides = array<i32>} : memref<1x4x256xf32, #tpu.memory_space<vmem>>, vector<1x4x256xf32>,
    return
  }
  func.func @transform_0(%arg0: i32) -> (i32, i32, i32) {
    %c0_i32 = arith.constant 0 : i32
    %c0_i32_0 = arith.constant 0 : i32
    %c0_i32_1 = arith.constant 0 : i32
    return %arg0, %c0_i32, %c0_i32_0 : i32, i32, i32
  }
  func.func @transform_1(%arg0: i32) -> (i32, i32) {
    %c0_i32 = arith.constant 0 : i32
    %c0_i32_0 = arith.constant 0 : i32
    %c0_i32_1 = arith.constant 0 : i32
    return %c0_i32, %c0_i32_0 : i32, i32
  }
  func.func @transform_2(%arg0: i32) -> (i32, i32, i32) {
    %c0_i32 = arith.constant 0 : i32
    %c0_i32_0 = arith.constant 0 : i32
    %c0_i32_1 = arith.constant 0 : i32
    %c0_i32_2 = arith.constant 0 : i32
    return %c0_i32, %c0_i32_0, %c0_i32_1 : i32, i32, i32
  }
  func.func @transform_3(%arg0: i32) -> (i32, i32) {
    %c0_i32 = arith.constant 0 : i32
    %c0_i32_0 = arith.constant 0 : i32
    %c0_i32_1 = arith.constant 0 : i32
    return %c0_i32, %c0_i32_0 : i32, i32
  }
  func.func @transform_4(%arg0: i32) -> (i32, i32, i32) {
    %c0_i32 = arith.constant 0 : i32
    %c0_i32_0 = arith.constant 0 : i32
    %c0_i32_1 = arith.constant 0 : i32
    %c0_i32_2 = arith.constant 0 : i32
    return %c0_i32, %c0_i32_0, %c0_i32_1 : i32, i32, i32
  }
  func.func @transform_5(%arg0: i32) -> (i32, i32) {
    %c0_i32 = arith.constant 0 : i32
    %c0_i32_0 = arith.constant 0 : i32
    %c0_i32_1 = arith.constant 0 : i32
    return %c0_i32, %c0_i32_0 : i32, i32
  }
  func.func @transform_6(%arg0: i32) -> (i32, i32, i32) {
    %c0_i32 = arith.constant 0 : i32
    %c0_i32_0 = arith.constant 0 : i32
    %c0_i32_1 = arith.constant 0 : i32
    return %arg0, %c0_i32, %c0_i32_0 : i32, i32, i32
  }
}

</mosaic_0001>

<bundles_post_ra>
// kernel: tpu_custom_call.1
= control target key start
LH: loop header
LB: loop body
LE: loop exit
PB: predicated region body
PF: predicated region fallthrough
CT: control target
= control target key end

     0   :  { %11 = vsyncpa [#allocation3], 0  ;;  %s2562_s0 = inlined_call_operand.vmem [shape: bf16[2,4,256], index: 0, kind: input, shape index: {}]   ;;  %s2563_s1 = inlined_call_operand.vmem [shape: s32[2,256], index: 1, kind: input, shape index: {}]   ;;  %s2564_s2 = inlined_call_operand.vmem [shape: bf16[9,4,4], index: 2, kind: input, shape index: {}]   ;;  %s2565_s3 = inlined_call_operand.vmem [shape: f32[4,1], index: 3, kind: input, shape index: {}]   ;;  %s2566_s4 = inlined_call_operand.vmem [shape: bf16[9,4,4], index: 4, kind: input, shape index: {}]   ;;  %s2567_s5 = inlined_call_operand.vmem [shape: f32[4,1], index: 5, kind: input, shape index: {}]   ;;  %s2568_s6 = inlined_call_operand.hbm [shape: f32[2,4,256], index: 6, kind: output, shape index: {}]  }
   0x1   :  { %13 = vsyncpa [#allocation3 + $0x1], 0  ;;  %s1935_s21 = smov 0   ;;  %s1937_s22 = smov 0  }
   0x2   :  { %s1939_s23 = smov 0   ;;  %s1941_s24 = smov 0  }
   0x3 LB: > { %s1956_s25 = sadd.s32 4294967295, %s1888_s24   ;;  %s1632_s26 = sadd.s32 4294967294, %s1888_s24   ;;  %s1888_s24 = sphi %s1941_s24, %s2721_s24   ;;  %s1884_s23 = sphi %s1939_s23, %s2720_s23   ;;  %s1880_s22 = sphi %s1937_s22, %s2719_s22   ;;  %s1876_s21 = sphi %s1935_s21, %s2718_s21  }
   0x4   : > { %s1960_s27 = sadd.s32 1, %s1888_s24   ;;  %s157_s28 = sadd.s32 1, %s1884_s23 }
   0x5   : > { %s154_s29 = ssub.s32 %s1888_s24, %s1960_s27  ;;  %p167_p0 = scmp.ne.s32.totalorder %s1884_s23, %s1880_s22 }
   0x6   : > { %p155_p1 = scmp.eq.s32.totalorder %s154_s29, 0  ;;  %p168_p2 = scmp.eq.s32.totalorder %s1956_s25, 1 }
   0x7   : > { %p173_p3 = scmp.ne.s32.totalorder %s1880_s22, %s1876_s21  ;;  %p174_p4 = scmp.eq.s32.totalorder %s1632_s26, 1 }
   0x8   : > { %s1971_s30 = scalar_select %p155_p1, %s1884_s23, %s157_s28  }
   0x9   : > { %p1973_p5 = por %p168_p2, %p167_p0  ;;  %p1977_p6 = por %p174_p4, %p173_p3 }
   0xa   : > { %p1635_p7 = scmp.ge.s32.totalorder %s1888_s24, 1  ;;  %p215_p8 = scmp.lt.s32.totalorder %s1888_s24, 3 }
   0xc   : > { %p216_p9 = pnand %p1635_p7, %p215_p8 }
   0xd   : > { %p245_p10 = scmp.lt.s32.totalorder (!%p216_p9), %s1956_s25, 1  ;;  %s1891_s14 = smov (!%p216_p9), 16  }
   0xe   : > { %219 = sbr.rel (%p216_p9) target bundleno = 769 (0x301), region = 44  ;;  %s1892_s15 = smov (!%p216_p9), 15  }
   0xf   : > { %s1893_s16 = smov (!%p216_p9), 17   ;;  %s1894_s17 = smov (!%p216_p9), 1  }
  0x10   : > { %s1895_s18 = smov (!%p216_p9), 127   ;;  %s1896_s19 = smov (!%p216_p9), 113  }
  0x11   : > { %s1897_s20 = smov (!%p216_p9), 112   ;;  %s1898_s26 = smov (!%p216_p9), 111  }
  0x13   : > { %v1890_v0 = vmov 0   ;;  %s246_s9 = scalar_select %p245_p10, %s1956_s25, 1  ;;  %v968_v5 = vld [vmem:[%s2565_s3] sm:$0xf]  ;;  %v296_v11 = vlaneseq  ;;  %v2594_v30 = vmov 0  ;;  %v2596_v31 = vmov 0 }
  0x14   : > { %384 = vmatprep.mubr.bf16.mxu0 %v1890_v0  ;;  %434 = vmatprep.mubr.bf16.mxu1 %v1890_v0  ;;  %v251_v6 = vld [vmem:[%s2563_s1] ss:$2 sm:$0x3]  ;;  %v2016_v7 = vld [vmem:[%s2563_s1 + $0x1] ss:$2 sm:$0x3] }
  0x15   : > { %1787 = vset.pattern.permute.xlu0 %v1890_v0  ;;  %s1697_s10 = sshll.u32 %s246_s9, 2  ;;  %vm254_vm0 = vcmp.ge.s32.totalorder %v251_v6, 1  ;;  %vm255_vm1 = vcmp.lt.s32.totalorder %v251_v6, 17  ;;  %vm2569_vm3 = vcmp.ge.s32.totalorder %v2016_v7, 0  ;;  %vm269_vm4 = vcmp.ge.s32.totalorder %v251_v6, 0 }
  0x16   : > { %s249_s13 = scalar_lea.vmem %s2562_s0, %s1697_s10  ;;  %vm2018_vm2 = vmand %vm254_vm0, %vm255_vm1  ;;  %vm270_vm5 = vcmp.lt.s32.totalorder %v251_v6, 16  ;;  %vm263_vm7 = vcmp.lt.s32.totalorder %v2016_v7, 16  ;;  %vm265_vm8 = vcmp.ge.s32.totalorder %v2016_v7, 4294967295  ;;  %vm278_vm12 = vcmp.ge.s32.totalorder %v251_v6, 4294967295  ;;  %v988_v46 = vld [vmem:[%s2566_s4] sm:$0x3] }
  0x17   : > { %v287_v1 = vld [vmem:[%s249_s13] sm:$0xf]  ;;  %vm262_vm6 = vmand %vm2018_vm2, %vm2569_vm3  ;;  %vm279_vm13 = vcmp.lt.s32.totalorder %v251_v6, 15  ;;  %vm257_vm15 = vcmp.ge.s32.totalorder %v2016_v7, 1  ;;  %v303_v13 = vshrl.u32 %v296_v11, 7  ;;  %v2075_v17 = vand.u32 127, %v296_v11 }
  0x18   : > { %v1991_v2 = vunpack.c.l.bf16 %v287_v1  ;;  %vm2029_vm9 = vmand %vm269_vm4, %vm270_vm5  ;;  %vm2570_vm4 = vcmp.lt.s32.totalorder %v2016_v7, 15  ;;  %v2600_v36 = vmov 0  ;;  %v2602_v39 = vmov 0 }
  0x19   : > { %vm274_vm10 = vmand %vm2029_vm9, %vm2569_vm3  ;;  %v2069_v15 = vsub.s32 1, %v303_v13  ;;  %v2071_v16 = vsub.s32 0, %v303_v13  ;;  %v2608_v44 = vmov 0 }
  0x1a   : > { %v1995_v3 = vcombine.high %v1991_v2, %v1991_v2  ;;  %vm2039_vm11 = vmand %vm262_vm6, %vm263_vm7  ;;  %vm259_vm6 = vcmp.lt.s32.totalorder %v2016_v7, 17 }
  0x1b   : > { %vm266_vm14 = vmand %vm2018_vm2, %vm265_vm8  ;;  %v324_v18 = vsel %vm2039_vm11, 1, %v1890_v0 }
  0x1c   : > { %v1747_v4 = vpack.i.bf16 %v1995_v3, %v1991_v2  ;;  %vm275_vm0 = vmand %vm274_vm10, %vm263_vm7  ;;  %v332_v24 = vrot.slane %v324_v18, %v2069_v15  ;;  %v328_v27 = vrot.slane %v324_v18, %v2071_v16  ;;  %v1674_v18 = vld [vmem:[%s2566_s4 + $0x6] sm:$0x3] }
  0x1d   : > { %vm2050_vm1 = vmand %vm278_vm12, %vm279_vm13  ;;  %v595_v14 = vsel %vm275_vm0, 1, %v1890_v0 }
  0x1e   : > { %1748 = vrot.lane.b32.xlu0 %v1747_v4, %s1891_s14  ;;  %1758 = vrot.lane.b32.xlu1 %v1747_v4, %s1892_s15  ;;  %vm258_vm5 = vmand %vm2018_vm2, %vm257_vm15  ;;  %v603_v20 = vrot.slane %v595_v14, %v2069_v15  ;;  %v599_v21 = vrot.slane %v595_v14, %v2071_v16 }
  0x1f   : > { %vm272_vm3 = vmand %vm2029_vm9, %vm257_vm15 }
  0x20   : > { %vm268_vm10 = vmand %vm266_vm14, %vm2570_vm4 }
  0x21   : > { %vm260_vm12 = vmand %vm258_vm5, %vm259_vm6  ;;  %v450_v19 = vsel %vm268_vm10, 1, %v1890_v0  ;;  %vm2111_vm5 = vcmp.eq.s32.totalorder %v603_v20, 1  ;;  %vm2115_vm10 = vcmp.eq.s32.totalorder %v599_v21, 1 }
  0x22   : > { %1753 = vrot.lane.b32.xlu0 %v1747_v4, %s1893_s16  ;;  %1763 = vrot.lane.b32.xlu1 %v1747_v4, %s1894_s17  ;;  %vm273_vm2 = vmand %vm272_vm3, %vm259_vm6  ;;  %vm2591_vm3 = vcmp.ge.s32.totalorder %v2016_v7, 0  ;;  %v301_v23 = vsel %vm260_vm12, 1, %v1890_v0  ;;  %v458_v26 = vrot.slane %v450_v19, %v2069_v15  ;;  %v454_v29 = vrot.slane %v450_v19, %v2071_v16 }
  0x23   : > { %vm276_vm13 = vmand %vm2029_vm9, %vm265_vm8  ;;  %v526_v25 = vsel %vm273_vm2, 1, %v1890_v0  ;;  %v309_v28 = vrot.slane %v301_v23, %v2069_v15  ;;  %v2595_v30 = vsel %vm2111_vm5, 4294967295, %v2594_v30  ;;  %v2597_v31 = vsel %vm2115_vm10, 4294967295, %v2596_v31 }
  0x24   : > { %vm281_vm14 = vmand %vm2050_vm1, %vm257_vm15  ;;  %v534_v32 = vrot.slane %v526_v25, %v2069_v15  ;;  %v305_v33 = vrot.slane %v301_v23, %v2071_v16  ;;  %vm2131_vm2 = vcmp.eq.s32.totalorder %v332_v24, 1  ;;  %v530_v37 = vrot.slane %v526_v25, %v2071_v16 }
  0x25   : > { %vm2095_vm11 = vmand %vm2050_vm1, %vm2591_vm3  ;;  %v2601_v36 = vsel %vm2131_vm2, 4294967295, %v2600_v36  ;;  %vm2138_vm3 = vcmp.eq.s32.totalorder %v328_v27, 1  ;;  %v2146_v40 = vsel %vm2111_vm5, %v1995_v3, 0.0  ;;  %v2151_v41 = vsel %vm2115_vm10, %v1991_v2, 0.0 }
  0x26   : > { %1768 = vrot.lane.b32.xlu0 %v1747_v4, %s1895_s18  ;;  %1773 = vrot.lane.b32.xlu1 %v1747_v4, %s1896_s19  ;;  %vm277_vm9 = vmand %vm276_vm13, %vm2570_vm4  ;;  %v2603_v39 = vsel %vm2138_vm3, 4294967295, %v2602_v39  ;;  %vm2180_vm4 = vcmp.eq.s32.totalorder %v530_v37, 1  ;;  %v609_v53 = vpack.c.bf16 %v2146_v40, %v2146_v40  ;;  %v608_v54 = vpack.c.bf16 %v2151_v41, %v2151_v41  ;;  %v1645_v40 = vld [vmem:[%s2564_s2 + $0x4] sm:$0x3] }
  0x27   : > { %vm282_vm0 = vmand %vm281_vm14, %vm259_vm6  ;;  %v671_v34 = vsel %vm277_vm9, 1, %v1890_v0  ;;  %vm2157_vm9 = vcmp.eq.s32.totalorder %v309_v28, 1  ;;  %vm2170_vm14 = vcmp.eq.s32.totalorder %v305_v33, 1  ;;  %vm2621_vm10 = vcmp.lt.s32.totalorder %v2075_v17, 15  ;;  %v1640_v33 = vld [vmem:[%s2564_s2 + $0x2] sm:$0x3] }
  0x28   : > { %vm2127_vm6 = vmand %vm2095_vm11, %vm263_vm7  ;;  %v747_v38 = vsel %vm282_vm0, 1, %v1890_v0  ;;  %vm2153_vm11 = vcmp.eq.s32.totalorder %v458_v26, 1  ;;  %vm2161_vm0 = vcmp.eq.s32.totalorder %v454_v29, 1  ;;  %v679_v45 = vrot.slane %v671_v34, %v2069_v15 }
  0x29   : > { %v2609_v44 = vsel %vm2161_vm0, 4294967295, %v2608_v44  ;;  %vm2166_vm7 = vcmp.eq.s32.totalorder %v534_v32, 1  ;;  %v755_v48 = vrot.slane %v747_v38, %v2069_v15  ;;  %v2178_v49 = vsel %vm2127_vm6, 1, %v1890_v0  ;;  %vm2194_vm13 = vmand %vm2050_vm1, %vm265_vm8 }
  0x2a   : > { %1778 = vrot.lane.b32.xlu0 %v1747_v4, %s1897_s20  ;;  %1783 = vrot.lane.b32.xlu1 %v1747_v4, %s1898_s26  ;;  %v675_v55 = vrot.slane %v671_v34, %v2071_v16  ;;  %vm2198_vm12 = vcmp.eq.s32.totalorder %v679_v45, 1  ;;  %v831_v62 = vrot.slane %v2178_v49, %v2069_v15  ;;  %v751_v63 = vrot.slane %v747_v38, %v2071_v16  ;;  %vm2622_vm8 = vmmov %vm2621_vm10 }
  0x2b   : > { %vm2620_vm6 = vcmp.lt.s32.totalorder %v2075_v17, 16  ;;  %vm2214_vm5 = vcmp.eq.s32.totalorder %v755_v48, 1  ;;  %vm2629_vm15 = vcmask 1041408   ;;  %v2633_v32 = vmov 0 }
  0x2c   : > { %vm2623_vm1 = vmmov %vm2620_vm6 }
  0x2e   : > { %971 = vperm.xlu0 %1787, %v968_v5  }
  0x90   : > { %v1749_v50 = vpop.permute.xlu0 %1748  ;;  %v1759_v51 = vpop.permute.xlu1 %1758 }
  0x91   : > { %v1751_v56 = vunpack.i.h.bf16 %v1749_v50  ;;  %v1750_v57 = vunpack.i.l.bf16 %v1749_v50  ;;  %v1761_v58 = vunpack.i.h.bf16 %v1759_v51  ;;  %v1760_v59 = vunpack.i.l.bf16 %v1759_v51 }
  0x93   : > { %v322_v1 = vsel %vm2620_vm6, %v1750_v57, %v1751_v56  ;;  %v448_v4 = vsel %vm2621_vm10, %v1760_v59, %v1761_v58  ;;  %v449_v5 = vsel %vm2622_vm8, %v1761_v58, %v1760_v59  ;;  %v323_v6 = vsel %vm2623_vm1, %v1751_v56, %v1750_v57 }
  0x94   : > { %v1754_v9 = vpop.permute.xlu0 %1753  ;;  %v336_v10 = vsel %vm2131_vm2, %v322_v1, 0.0  ;;  %v462_v11 = vsel %vm2153_vm11, %v448_v4, 0.0  ;;  %v335_v12 = vsel %vm2138_vm3, %v323_v6, 0.0  ;;  %v1764_v13 = vpop.permute.xlu1 %1763  ;;  %v461_v14 = vsel %vm2161_vm0, %v449_v5, 0.0  ;;  %vm2630_vm0 = vmmov %vm2629_vm15  ;;  %v316_v6 = vld [vmem:[%s2564_s2] sm:$0x3] }
  0x95   : > { %vm2226_vm10 = vcmp.eq.s32.totalorder %v675_v55, 1  ;;  %vm2628_vm6 = vcmp.lt.s32.totalorder %v2016_v7, 15  ;;  %v1756_v19 = vunpack.i.h.bf16 %v1754_v9  ;;  %v1755_v20 = vunpack.i.l.bf16 %v1754_v9 }
  0x96   : > { %vm286_vm8 = vmand %vm2194_vm13, %vm2628_vm6  ;;  %v338_v21 = vpack.c.bf16 %v336_v10, %v336_v10  ;;  %v337_v22 = vpack.c.bf16 %v335_v12, %v335_v12  ;;  %vm2576_vm1 = vcmp.lt.s32.totalorder %v2075_v17, 112  ;;  %v1766_v23 = vunpack.i.h.bf16 %v1764_v13 }
  0x97   : > { %v1765_v24 = vunpack.i.l.bf16 %v1764_v13  ;;  %v464_v25 = vpack.c.bf16 %v462_v11, %v462_v11  ;;  %v463_v26 = vpack.c.bf16 %v461_v14, %v461_v14  ;;  %vm2631_vm3 = vcmp.lt.s32.totalorder %v2075_v17, 17 }
  0x98   : > { %1641 = vmatprep.subr.msk.bf16.mxu0 %vm2629_vm15, %v338_v21  ;;  %v347_v27 = vsel %vm2630_vm0, %v337_v22, 0  ;;  %v299_v7 = vsel %vm2631_vm3, %v1755_v20, %v1756_v19  ;;  %vm2632_vm2 = vmmov %vm2631_vm3  ;;  %v2242_v29 = vsel %vm286_vm8, 1, %v1890_v0  ;;  %vm2244_vm13 = vcmp.eq.s32.totalorder %v751_v63, 1  ;;  %v1769_v45 = vpop.permute.xlu0 %1768  ;;  %v1774_v48 = vpop.permute.xlu1 %1773 }
  0x99   : > { %v300_v28 = vsel %vm2632_vm2, %v1756_v19, %v1755_v20  ;;  %v2634_v32 = vsel %vm2244_vm13, 4294967295, %v2633_v32  ;;  %367 = vmatpush1.bf16.msra.mxu0 %v347_v27  ;;  %v313_v34 = vsel %vm2157_vm9, %v299_v7, 0.0  ;;  %vm2635_vm15 = vcmp.lt.s32.totalorder %v2075_v17, 1  ;;  %vm2637_vm3 = vmmov %vm2630_vm0 }
  0x9a   : > { %v524_v35 = vsel %vm2635_vm15, %v1765_v24, %v1766_v23  ;;  %vm2636_vm2 = vmmov %vm2635_vm15  ;;  %v312_v38 = vsel %vm2170_vm14, %v300_v28, 0.0  ;;  %v315_v50 = vpack.c.bf16 %v313_v34, %v313_v34  ;;  %1646 = vmatprep.subr.msk.bf16.mxu0 %vm2637_vm3, %v464_v25  ;;  %v471_v56 = vsel %vm2630_vm0, %v463_v26, 0 }
  0x9b   : > { %v525_v37 = vsel %vm2636_vm2, %v1766_v23, %v1765_v24  ;;  %v538_v51 = vsel %vm2166_vm7, %v524_v35, 0.0  ;;  %v314_v55 = vpack.c.bf16 %v312_v38, %v312_v38  ;;  %v1771_v58 = vunpack.i.h.bf16 %v1769_v45  ;;  %vm2639_vm8 = vmmov %vm2630_vm0 }
  0x9c   : > { %v540_v57 = vpack.c.bf16 %v538_v51, %v538_v51  ;;  %v1770_v59 = vunpack.i.l.bf16 %v1769_v45  ;;  %v537_v60 = vsel %vm2180_vm4, %v525_v37, 0.0  ;;  %vm2638_vm6 = vcmask 31744   ;;  %1643 = vmatprep.subr.msk.bf16.mxu1 %vm2639_vm8, %v315_v50  ;;  %vm2640_vm15 = vmmov %vm2630_vm0  ;;  %v1779_v12 = vpop.permute.xlu0 %1778  ;;  %v1784_v13 = vpop.permute.xlu1 %1783 }
  0x9d   : > { %1642 = vmatmul.mubr.msk.bf16.vlgmr.msra.gmra.mxu0 %vm2638_vm6, %v1640_v33  ;;  %v397_v63 = vsel %vm2640_vm15, %v314_v55, 0  ;;  %v539_v1 = vpack.c.bf16 %v537_v60, %v537_v60  ;;  %v1776_v4 = vunpack.i.h.bf16 %v1774_v48  ;;  %v1775_v5 = vunpack.i.l.bf16 %v1774_v48  ;;  %vm2645_vm6 = vmmov %vm2639_vm8  ;;  %v1648_v48 = vld [vmem:[%s2564_s2 + $0x6] sm:$0x3] }
  0x9e   : > { %417 = vmatpush1.bf16.msra.mxu1 %v397_v63  ;;  %491 = vmatpush1.bf16.msra.mxu0 %v471_v56  ;;  %vm2641_vm2 = vcmp.lt.s32.totalorder %v2075_v17, 127  ;;  %vm2275_vm0 = vcmp.eq.s32.totalorder %v831_v62, 1  ;;  %v827_v14 = vrot.slane %v2178_v49, %v2071_v16  ;;  %vm2646_vm8 = vmmov %vm2645_vm6  ;;  %vm2647_vm15 = vcmp.lt.s32.totalorder %v2075_v17, 113 }
  0x9f   : > { %v669_v9 = vsel %vm2641_vm2, %v1770_v59, %v1771_v58  ;;  %vm2642_vm3 = vmmov %vm2641_vm2  ;;  %508 = vmatprep.mubr.bf16.mxu0 %v1890_v0  ;;  %1649 = vmatprep.subr.msk.bf16.mxu1 %vm2645_vm6, %v540_v57  ;;  %v547_v20 = vsel %vm2646_vm8, %v539_v1, 0  ;;  %v746_v62 = vsel %vm2647_vm15, %v1776_v4, %v1775_v5  ;;  %v907_v21 = vrot.slane %v2242_v29, %v2069_v15 }
  0xa0   : > { %v670_v10 = vsel %vm2642_vm3, %v1771_v58, %v1770_v59  ;;  %vm2648_vm2 = vmmov %vm2645_vm6  ;;  %v759_v49 = vsel %vm2214_vm5, %v746_v62, 0.0  ;;  %v1781_v23 = vunpack.i.h.bf16 %v1779_v12  ;;  %v1780_v24 = vunpack.i.l.bf16 %v1779_v12  ;;  %v1651_v58 = vld [vmem:[%s2564_s2 + $0x8] sm:$0x3]  ;;  %v1660_v12 = vld [vmem:[%s2564_s2 + $0xe] sm:$0x3] }
  0xa1   : > { %v683_v19 = vsel %vm2198_vm12, %v670_v10, 0.0  ;;  %1652 = vmatprep.subr.msk.bf16.mxu0 %vm2648_vm2, %v609_v53  ;;  %vm2649_vm3 = vcmask 31744   ;;  %vm2650_vm6 = vmmov %vm2647_vm15  ;;  %v682_v26 = vsel %vm2226_vm10, %v669_v9, 0.0  ;;  %v1786_v15 = vunpack.i.h.bf16 %v1784_v13  ;;  %v1657_v9 = vld [vmem:[%s2564_s2 + $0xc] sm:$0x3] }
  0xa2   : > { %v685_v22 = vpack.c.bf16 %v683_v19, %v683_v19  ;;  %1644 = vmatmul.mubr.msk.bf16.vlgmr.msra.gmra.mxu1 %vm2649_vm3, %v316_v6  ;;  %v745_v25 = vsel %vm2650_vm6, %v1775_v5, %v1776_v4  ;;  %v1785_v27 = vunpack.i.l.bf16 %v1784_v13  ;;  %v822_v53 = vsel %vm2576_vm1, %v1781_v23, %v1780_v24  ;;  %vm2651_vm15 = vmmov %vm2648_vm2  ;;  %v1654_v4 = vld [vmem:[%s2564_s2 + $0xa] sm:$0x3]  ;;  %v1663_v13 = vld [vmem:[%s2564_s2 + $0x10] sm:$0x3] }
  0xa3   : > { %567 = vmatpush1.bf16.msra.mxu1 %v547_v20  ;;  %584 = vmatprep.mubr.bf16.mxu1 %v1890_v0  ;;  %vm2578_vm8 = vcmp.lt.s32.totalorder %v2075_v17, 111  ;;  %v616_v7 = vsel %vm2651_vm15, %v608_v54, 0  ;;  %v684_v28 = vpack.c.bf16 %v682_v26, %v682_v26  ;;  %v761_v33 = vpack.c.bf16 %v759_v49, %v759_v49 }
  0xa4   : > { %1655 = vmatprep.subr.msk.bf16.mxu1 %vm2648_vm2, %v685_v22  ;;  %v835_v34 = vsel %vm2275_vm0, %v822_v53, 0.0  ;;  %v758_v35 = vsel %vm2244_vm13, %v745_v25, 0.0  ;;  %vm2317_vm3 = vcmp.eq.s32.totalorder %v827_v14, 1  ;;  %v2652_v37 = vmov 0 }
  0xa5   : > { %v2653_v37 = vsel %vm2317_vm3, 4294967295, %v2652_v37  ;;  %vm2654_vm6 = vcmask 31744   ;;  %v821_v41 = vsel %vm2576_vm1, %v1780_v24, %v1781_v23  ;;  %vm2324_vm15 = vcmp.eq.s32.totalorder %v907_v21, 1 }
  0xa6   : > { %1647 = vmatmul.mubr.msk.bf16.vlgmr.msra.gmra.mxu0 %vm2654_vm6, %v1645_v40  ;;  %v898_v38 = vsel %vm2578_vm8, %v1786_v15, %v1785_v27  ;;  %v903_v45 = vrot.slane %v2242_v29, %v2071_v16  ;;  %v692_v50 = vsel %vm2648_vm2, %v684_v28, 0  ;;  %vm2657_vm6 = vmmov %vm2648_vm2  ;;  %v760_v51 = vpack.c.bf16 %v758_v35, %v758_v35 }
  0xa7   : > { %636 = vmatpush1.bf16.msra.mxu0 %v616_v7  ;;  %653 = vmatprep.mubr.bf16.mxu0 %v1890_v0  ;;  %v837_v55 = vpack.c.bf16 %v835_v34, %v835_v34  ;;  %v911_v56 = vsel %vm2324_vm15, %v898_v38, 0.0  ;;  %v834_v57 = vsel %vm2317_vm3, %v821_v41, 0.0  ;;  %vm2658_vm1 = vcmask 31744   ;;  %vm2663_vm3 = vmmov %vm2648_vm2 }
  0xa8   : > { %1658 = vmatprep.subr.msk.bf16.mxu0 %vm2657_vm6, %v761_v33  ;;  %v897_v16 = vsel %vm2578_vm8, %v1785_v27, %v1786_v15  ;;  %vm2345_vm13 = vcmp.eq.s32.totalorder %v903_v45, 1  ;;  %v2659_v29 = vmov 0  ;;  %v768_v59 = vsel %vm2648_vm2, %v760_v51, 0  ;;  %vm2661_vm6 = vmmov %vm2648_vm2 }
  0xa9   : > { %v2660_v29 = vsel %vm2345_vm13, 4294967295, %v2659_v29  ;;  %v836_v60 = vpack.c.bf16 %v834_v57, %v834_v57  ;;  %v913_v63 = vpack.c.bf16 %v911_v56, %v911_v56  ;;  %v910_v1 = vsel %vm2345_vm13, %v897_v16, 0.0  ;;  %vm2662_vm8 = vmmov %vm2648_vm2 }
  0xaa   : > { %1650 = vmatmul.mubr.msk.bf16.vlgmr.msra.gmra.mxu1 %vm2658_vm1, %v1648_v48  ;;  %v912_v6 = vpack.c.bf16 %v910_v1, %v910_v1  ;;  %vm2664_vm2 = vmmov %vm2658_vm1  ;;  %vm2673_vm13 = vnez %v2603_v39 }
  0xab   : > { %712 = vmatpush1.bf16.msra.mxu1 %v692_v50  ;;  %729 = vmatprep.mubr.bf16.mxu1 %v1890_v0  ;;  %v844_v5 = vsel %vm2662_vm8, %v836_v60, 0  ;;  %vm2666_vm8 = vmmov %vm2658_vm1 }
  0xac   : > { %1661 = vmatprep.subr.msk.bf16.mxu1 %vm2661_vm6, %v837_v55  ;;  %vm2665_vm6 = vmmov %vm2663_vm3 }
  0xad   : > { %v920_v10 = vsel %vm2665_vm6, %v912_v6, 0 }
  0xae   : > { %1653 = vmatmul.mubr.msk.bf16.vlgmr.msra.gmra.mxu0 %vm2658_vm1, %v1651_v58 }
  0xaf   : > { %788 = vmatpush1.bf16.msra.mxu0 %v768_v59  ;;  %805 = vmatprep.mubr.bf16.mxu0 %v1890_v0 }
  0xb0   : > { %1664 = vmatprep.subr.msk.bf16.mxu0 %vm2663_vm3, %v913_v63  ;;  %vm2667_vm3 = vmmov %vm2658_vm1 }
  0xb2   : > { %1656 = vmatmul.mubr.msk.bf16.vlgmr.msra.gmra.mxu1 %vm2664_vm2, %v1654_v4  ;;  %vm2668_vm2 = vcmp.lt.s32.totalorder %v2075_v17, 15 }
  0xb3   : > { %864 = vmatpush1.bf16.msra.mxu1 %v844_v5  ;;  %881 = vmatprep.mubr.bf16.mxu1 %v1890_v0  ;;  %vm2669_vm6 = vmmov %vm2668_vm2 }
  0xb6   : > { %1659 = vmatmul.mubr.msk.bf16.vlgmr.msra.gmra.mxu0 %vm2658_vm1, %v1657_v9  ;;  %vm2670_vm1 = vcmp.lt.s32.totalorder %v2075_v17, 16 }
  0xb7   : > { %940 = vmatpush1.bf16.msra.mxu0 %v920_v10  ;;  %957 = vmatprep.mubr.bf16.mxu0 %v1890_v0 }
  0xba   : > { %1662 = vmatmul.mubr.msk.bf16.vlgmr.msra.gmra.mxu1 %vm2666_vm8, %v1660_v12  ;;  %vm2671_vm8 = vmmov %vm2670_vm1 }
  0xbb   : > { %1042 = vmatprep.mubr.bf16.mxu1 %v1890_v0 }
  0xbe   : > { %1665 = vmatmul.mubr.msk.bf16.vlgmr.msra.gmra.mxu0 %vm2667_vm3, %v1663_v13  ;;  %vm2672_vm3 = vnez %v2601_v36 }
  0xbf   : > { %1092 = vmatprep.mubr.bf16.mxu0 %v1890_v0 }
 0x15d   : > { %v386_v14 = vpop.f32.mrf.mxu0 }
 0x15f   : > { %v388_v19 = vpop.f32.mrf.mxu0 }
 0x161   : > { %v390_v20 = vpop.f32.mrf.mxu0 }
 0x162   : > { %v436_v62 = vpop.f32.mrf.mxu1 }
 0x163   : > { %v391_v21 = vpop.f32.mrf.mxu0  ;;  %v437_v34 = vadd.f32 %v436_v62, %v386_v14 }
 0x164   : > { %v438_v49 = vpop.f32.mrf.mxu1 }
 0x165   : > { %v439_v38 = vadd.f32 %v438_v49, %v388_v19  ;;  %v972_v19 = vpop.permute.xlu0 %971 }
 0x166   : > { %v440_v22 = vpop.f32.mrf.mxu1  ;;  %v510_v23 = vpop.f32.mrf.mxu0 }
 0x167   : > { %v517_v45 = vadd.f32 %v510_v23, %v437_v34 }
 0x168   : > { %v441_v24 = vpop.f32.mrf.mxu1  ;;  %v512_v25 = vpop.f32.mrf.mxu0 }
 0x169   : > { %v518_v51 = vadd.f32 %v512_v25, %v439_v38 }
 0x16a   : > { %v514_v26 = vpop.f32.mrf.mxu0  ;;  %v586_v15 = vpop.f32.mrf.mxu1 }
 0x16b   : > { %v593_v55 = vadd.f32 %v586_v15, %v517_v45 }
 0x16c   : > { %v515_v27 = vpop.f32.mrf.mxu0  ;;  %v588_v40 = vpop.f32.mrf.mxu1 }
 0x16d   : > { %v594_v16 = vadd.f32 %v588_v40, %v518_v51 }
 0x16e   : > { %v590_v53 = vpop.f32.mrf.mxu1  ;;  %v655_v7 = vpop.f32.mrf.mxu0 }
 0x16f   : > { %v662_v58 = vadd.f32 %v655_v7, %v593_v55 }
 0x170   : > { %v591_v28 = vpop.f32.mrf.mxu1  ;;  %v657_v33 = vpop.f32.mrf.mxu0 }
 0x171   : > { %v663_v63 = vadd.f32 %v657_v33, %v594_v16  ;;  %v1543_v28 = vld [vmem:[%s2567_s5] sm:$0xf] }
 0x172   : > { %v659_v35 = vpop.f32.mrf.mxu0  ;;  %v731_v41 = vpop.f32.mrf.mxu1 }
 0x173   : > { %v738_v1 = vadd.f32 %v731_v41, %v662_v58 }
 0x174   : > { %v660_v48 = vpop.f32.mrf.mxu0  ;;  %v733_v50 = vpop.f32.mrf.mxu1 }
 0x175   : > { %v739_v6 = vadd.f32 %v733_v50, %v663_v63 }
 0x176   : > { %v735_v56 = vpop.f32.mrf.mxu1  ;;  %v807_v57 = vpop.f32.mrf.mxu0 }
 0x177   : > { %v814_v9 = vadd.f32 %v807_v57, %v738_v1 }
 0x178   : > { %v736_v59 = vpop.f32.mrf.mxu1  ;;  %v809_v60 = vpop.f32.mrf.mxu0 }
 0x179   : > { %v815_v13 = vadd.f32 %v809_v60, %v739_v6 }
 0x17a   : > { %v811_v4 = vpop.f32.mrf.mxu0  ;;  %v883_v5 = vpop.f32.mrf.mxu1 }
 0x17b   : > { %v890_v14 = vadd.f32 %v883_v5, %v814_v9 }
 0x17c   : > { %v812_v10 = vpop.f32.mrf.mxu0  ;;  %v885_v12 = vpop.f32.mrf.mxu1 }
 0x17d   : > { %v891_v21 = vadd.f32 %v885_v12, %v815_v13 }
 0x17e   : > { %v887_v20 = vpop.f32.mrf.mxu1  ;;  %v959_v62 = vpop.f32.mrf.mxu0 }
 0x17f   : > { %v966_v49 = vadd.f32 %v959_v62, %v890_v14 }
 0x180   : > { %v888_v22 = vpop.f32.mrf.mxu1  ;;  %v961_v23 = vpop.f32.mrf.mxu0 }
 0x181   : > { %v974_v24 = vadd.f32 %v972_v19, %v966_v49  ;;  %v967_v25 = vadd.f32 %v961_v23, %v891_v21  ;;  %v1666_v49 = vld [vmem:[%s2566_s4 + $0x2] sm:$0x3] }
 0x182   : > { %v963_v26 = vpop.f32.mrf.mxu0 }
 0x183   : > { %v975_v15 = vadd.f32 %v972_v19, %v967_v25  ;;  %v976_v40 = vmax.f32 %v974_v24, 0.0 }
 0x184   : > { %v964_v27 = vpop.f32.mrf.mxu0 }
 0x185   : > { %v977_v53 = vmax.f32 %v975_v15, 0.0 }
 0x187   : > { %v1798_v7 = vpack.i.bf16 %v977_v53, %v976_v40 }
 0x189   : > { %1799 = vrot.lane.b32.xlu0 %v1798_v7, %s1892_s15  ;;  %1789 = vrot.lane.b32.xlu1 %v1798_v7, %s1891_s14 }
 0x18d   : > { %1809 = vrot.lane.b32.xlu0 %v1798_v7, %s1895_s18  ;;  %1794 = vrot.lane.b32.xlu1 %v1798_v7, %s1893_s16 }
 0x191   : > { %1819 = vrot.lane.b32.xlu0 %v1798_v7, %s1897_s20  ;;  %1804 = vrot.lane.b32.xlu1 %v1798_v7, %s1894_s17  ;;  %s242_s17 = sand.u32 1, %s1880_s22  }
 0x192   : > { %s1636_s18 = sshll.u32 %s242_s17, 3  ;;  %s1559_s29 = scalar_lea.sflag [#allocation3], %s242_s17 }
 0x193   : > { %s244_s20 = scalar_lea.vmem [#allocation2], %s1636_s18 }
 0x195   : > { %1546 = vperm.xlu0 %1787, %v1543_v28   ;;  %1814 = vrot.lane.b32.xlu1 %v1798_v7, %s1896_s19  ;;  %s1698_s19 = sshll.u32 %s1956_s25, 7  ;;  %s1899_s25 = smov [#allocation2]  }
 0x196   : > { %s1571_s28 = scalar_lea.hbm %s2568_s6, %s1698_s19  ;;  %s1832_s10 = sshll.u32 %s1899_s25, 4  ;;  %s1833_s10 = int_to_ptr.vmem [resolvable:$false] %s1832_s10 }
 0x197   : > { %s1834_s11 = scalar_lea.vmem %s1833_s10, 256 }
 0x199   : > { %1824 = vrot.lane.b32.xlu1 %v1798_v7, %s1898_s26  ;;  %s1573_s26 = sshll.u32 %s244_s20, 4  ;;  %s1574_s26 = int_to_ptr.vmem [resolvable:$true] %s1573_s26 }
 0x19a   : > { %s1828_s9 = scalar_lea.vmem %s1574_s26, 128  ;;  %p1835_p0 = scmp.lt.s32.totalorder %s1574_s26, %s1833_s10 }
 0x19b   : > { %p1829_p11 = scmp.ne.s32.totalorder %s1574_s26, %s1828_s9  ;;  %p1836_p1 = scmp.lt.s32.totalorder %s1834_s11, %s1828_s9 }
 0x19d   : > { %p1830_p12 = pnand %p1829_p11, %p1973_p5  ;;  %p1837_p2 = por %p1836_p1, %p1835_p0 }
 0x19f   : > { %p1831_p13 = pneg %p1830_p12 }
 0x1a1   : > { %p1838_p3 = pnand %p1837_p2, %p1831_p13 }
 0x1fb   : > { %v1800_v33 = vpop.permute.xlu0 %1799  ;;  %v1790_v34 = vpop.permute.xlu1 %1789 }
 0x1fc   : > { %v1802_v35 = vunpack.i.h.bf16 %v1800_v33  ;;  %v1801_v41 = vunpack.i.l.bf16 %v1800_v33  ;;  %v1792_v38 = vunpack.i.h.bf16 %v1790_v34  ;;  %v1791_v45 = vunpack.i.l.bf16 %v1790_v34 }
 0x1fe   : > { %v1105_v48 = vsel %vm2668_vm2, %v1801_v41, %v1802_v35  ;;  %v1106_v50 = vsel %vm2669_vm6, %v1802_v35, %v1801_v41  ;;  %v993_v51 = vsel %vm2670_vm1, %v1791_v45, %v1792_v38  ;;  %v994_v55 = vsel %vm2671_vm8, %v1792_v38, %v1791_v45 }
 0x1ff   : > { %v1108_v56 = vsel %vm2153_vm11, %v1105_v48, 0.0  ;;  %v996_v57 = vsel %vm2672_vm3, %v993_v51, 0.0  ;;  %v1810_v16 = vpop.permute.xlu0 %1809  ;;  %v1795_v58 = vpop.permute.xlu1 %1794  ;;  %v995_v59 = vsel %vm2673_vm13, %v994_v55, 0.0  ;;  %vm2674_vm2 = vnez %v2609_v44 }
 0x200   : > { %v1107_v60 = vsel %vm2674_vm2, %v1106_v50, 0.0  ;;  %v1812_v63 = vunpack.i.h.bf16 %v1810_v16  ;;  %v1811_v1 = vunpack.i.l.bf16 %v1810_v16  ;;  %v1797_v4 = vunpack.i.h.bf16 %v1795_v58 }
 0x201   : > { %v1796_v5 = vunpack.i.l.bf16 %v1795_v58  ;;  %v998_v6 = vpack.c.bf16 %v996_v57, %v996_v57  ;;  %v997_v9 = vpack.c.bf16 %v995_v59, %v995_v59  ;;  %vm2675_vm6 = vnez %v2595_v30 }
 0x202   : > { %v1230_v42 = vsel %vm2675_vm6, %v977_v53, 0.0  ;;  %vm2676_vm11 = vcmp.lt.s32.totalorder %v2075_v17, 127  ;;  %vm2677_vm1 = vcmp.lt.s32.totalorder %v2075_v17, 17  ;;  %v1110_v44 = vpack.c.bf16 %v1108_v56, %v1108_v56  ;;  %v1671_v56 = vld [vmem:[%s2566_s4 + $0x4] sm:$0x3] }
 0x203   : > { %v1292_v36 = vsel %vm2676_vm11, %v1812_v63, %v1811_v1  ;;  %v982_v10 = vsel %vm2677_vm1, %v1796_v5, %v1797_v4  ;;  %vm2678_vm13 = vmmov %vm2677_vm1  ;;  %vm2679_vm8 = vcmask 1041408   ;;  %v2420_v13 = vpop.permute.xlu0 %1819  ;;  %v1805_v14 = vpop.permute.xlu1 %1804  ;;  %v1109_v20 = vpack.c.bf16 %v1107_v60, %v1107_v60 }
 0x204   : > { %v983_v39 = vsel %vm2678_vm13, %v1797_v4, %v1796_v5  ;;  %v985_v12 = vsel %vm2157_vm9, %v982_v10, 0.0  ;;  %1667 = vmatprep.subr.msk.bf16.mxu1 %vm2679_vm8, %v998_v6  ;;  %vm2680_vm3 = vmmov %vm2679_vm8  ;;  %v1807_v62 = vunpack.i.h.bf16 %v1805_v14  ;;  %v1806_v21 = vunpack.i.l.bf16 %v1805_v14 }
 0x205   : > { %v1005_v30 = vsel %vm2680_vm3, %v997_v9, 0  ;;  %v984_v19 = vsel %vm2170_vm14, %v983_v39, 0.0  ;;  %vm2681_vm9 = vnez %v2597_v31  ;;  %v1294_v22 = vsel %vm2198_vm12, %v1292_v36, 0.0  ;;  %vm2682_vm2 = vmmov %vm2680_vm3 }
 0x206   : > { %1025 = vmatpush1.bf16.msra.mxu1 %v1005_v30  ;;  %v1229_v43 = vsel %vm2681_vm9, %v976_v40, 0.0  ;;  %v987_v23 = vpack.c.bf16 %v985_v12, %v985_v12  ;;  %v986_v24 = vpack.c.bf16 %v984_v19, %v984_v19  ;;  %v1232_v47 = vpack.c.bf16 %v1230_v42, %v1230_v42  ;;  %vm2686_vm12 = vmmov %vm2682_vm2  ;;  %v1683_v30 = vld [vmem:[%s2566_s4 + $0xc] sm:$0x3] }
 0x207   : > { %1672 = vmatprep.subr.msk.bf16.mxu1 %vm2682_vm2, %v1110_v44  ;;  %v1822_v25 = vunpack.i.h.bf16 %v2420_v13  ;;  %v1821_v26 = vunpack.i.l.bf16 %v2420_v13  ;;  %vm2683_vm14 = vcmp.lt.s32.totalorder %v2075_v17, 1  ;;  %vm2685_vm11 = vcmask 31744   ;;  %v1815_v61 = vpop.permute.xlu1 %1814  ;;  %vm2687_vm1 = vmmov %vm2682_vm2  ;;  %v1680_v13 = vld [vmem:[%s2566_s4 + $0xa] sm:$0x3] }
 0x208   : > { %v1169_v15 = vsel %vm2683_vm14, %v1806_v21, %v1807_v62  ;;  %vm2684_vm6 = vmmov %vm2683_vm14  ;;  %1669 = vmatprep.subr.msk.bf16.mxu0 %vm2686_vm12, %v987_v23  ;;  %v1055_v40 = vsel %vm2687_vm1, %v986_v24, 0  ;;  %v1817_v28 = vunpack.i.h.bf16 %v1815_v61  ;;  %v1816_v33 = vunpack.i.l.bf16 %v1815_v61 }
 0x209   : > { %v1170_v27 = vsel %vm2684_vm6, %v1807_v62, %v1806_v21  ;;  %v1172_v31 = vsel %vm2166_vm7, %v1169_v15, 0.0  ;;  %1668 = vmatmul.mubr.msk.bf16.vlgmr.msra.gmra.mxu1 %vm2685_vm11, %v1666_v49  ;;  %vm2688_vm13 = vmmov %vm2687_vm1  ;;  %1075 = vmatpush1.bf16.msra.mxu0 %v1055_v40  ;;  %vm2689_vm7 = vcmp.lt.s32.totalorder %v2075_v17, 127  ;;  %vm2691_vm3 = vcmp.lt.s32.totalorder %v2075_v17, 113 }
 0x20a   : > { %v1117_v53 = vsel %vm2688_vm13, %v1109_v20, 0  ;;  %v1171_v7 = vsel %vm2180_vm4, %v1170_v27, 0.0  ;;  %v1174_v34 = vpack.c.bf16 %v1172_v31, %v1172_v31  ;;  %v1291_v41 = vsel %vm2689_vm7, %v1811_v1, %v1812_v63  ;;  %vm2690_vm8 = vmmov %vm2687_vm1  ;;  %1154 = vmatprep.mubr.bf16.mxu1 %v1890_v0  ;;  %v1689_v20 = vld [vmem:[%s2566_s4 + $0x10] sm:$0x3] }
 0x20b   : > { %1137 = vmatpush1.bf16.msra.mxu1 %v1117_v53  ;;  %v1173_v35 = vpack.c.bf16 %v1171_v7, %v1171_v7  ;;  %v1356_v52 = vsel %vm2691_vm3, %v1817_v28, %v1816_v33  ;;  %vm2692_vm4 = vmmov %vm2687_vm1  ;;  %v1825_v48 = vpop.permute.xlu1 %1824  ;;  %v1296_v50 = vpack.c.bf16 %v1294_v22, %v1294_v22  ;;  %v1231_v51 = vpack.c.bf16 %v1229_v43, %v1229_v43 }
 0x20c   : > { %1678 = vmatprep.subr.msk.bf16.mxu1 %vm2690_vm8, %v1232_v47  ;;  %1675 = vmatprep.subr.msk.bf16.mxu0 %vm2692_vm4, %v1174_v34  ;;  %vm2693_vm9 = vmmov %vm2687_vm1  ;;  %v1358_v45 = vsel %vm2214_vm5, %v1356_v52, 0.0  ;;  %vm2695_vm14 = vcmp.lt.s32.totalorder %v2075_v17, 112  ;;  %v1293_v57 = vsel %vm2226_vm10, %v1291_v41, 0.0  ;;  %v1827_v16 = vunpack.i.h.bf16 %v1825_v48 }
 0x20d   : > { %v1181_v38 = vsel %vm2693_vm9, %v1173_v35, 0  ;;  %vm2694_vm2 = vmmov %vm2685_vm11  ;;  %v1420_v55 = vsel %vm2695_vm14, %v1822_v25, %v1821_v26  ;;  %v1826_v58 = vunpack.i.l.bf16 %v1825_v48  ;;  %v1360_v59 = vpack.c.bf16 %v1358_v45, %v1358_v45 }
 0x20e   : > { %1670 = vmatmul.mubr.msk.bf16.vlgmr.msra.gmra.mxu0 %vm2694_vm2, %v988_v46  ;;  %vm2696_vm5 = vmmov %vm2691_vm3  ;;  %v1295_v63 = vpack.c.bf16 %v1293_v57, %v1293_v57  ;;  %v1422_v1 = vsel %vm2275_vm0, %v1420_v55, 0.0  ;;  %vm2700_vm10 = vnez %v2634_v32  ;;  %vm2702_vm13 = vcmp.lt.s32.totalorder %v2075_v17, 111  ;;  %v1677_v32 = vld [vmem:[%s2566_s4 + $0x8] sm:$0x3] }
 0x20f   : > { %1201 = vmatpush1.bf16.msra.mxu0 %v1181_v38  ;;  %1218 = vmatprep.mubr.bf16.mxu0 %v1890_v0  ;;  %v1355_v8 = vsel %vm2696_vm5, %v1816_v33, %v1817_v28  ;;  %vm2697_vm6 = vmmov %vm2687_vm1  ;;  %v1484_v6 = vsel %vm2702_vm13, %v1827_v16, %v1826_v58  ;;  %v1424_v9 = vpack.c.bf16 %v1422_v1, %v1422_v1 }
 0x210   : > { %1681 = vmatprep.subr.msk.bf16.mxu0 %vm2697_vm6, %v1296_v50  ;;  %vm2698_vm11 = vmmov %vm2694_vm2  ;;  %v1357_v4 = vsel %vm2700_vm10, %v1355_v8, 0.0  ;;  %v1486_v36 = vsel %vm2324_vm15, %v1484_v6, 0.0  ;;  %vm2706_vm3 = vnez %v2653_v37  ;;  %vm2710_vm15 = vnez %v2660_v29  ;;  %v1686_v29 = vld [vmem:[%s2566_s4 + $0xe] sm:$0x3] }
 0x211   : > { %1673 = vmatmul.mubr.msk.bf16.vlgmr.msra.gmra.mxu1 %vm2698_vm11, %v1671_v56  ;;  %vm2699_vm12 = vmmov %vm2687_vm1  ;;  %v1359_v42 = vpack.c.bf16 %v1357_v4, %v1357_v4  ;;  %v1488_v44 = vpack.c.bf16 %v1486_v36, %v1486_v36 }
 0x212   : > { %v1239_v60 = vsel %vm2699_vm12, %v1231_v51, 0  ;;  %1276 = vmatprep.mubr.bf16.mxu1 %v1890_v0  ;;  %vm2701_vm1 = vmmov %vm2695_vm14 }
 0x213   : > { %1259 = vmatpush1.bf16.msra.mxu1 %v1239_v60  ;;  %v1419_v5 = vsel %vm2701_vm1, %v1821_v26, %v1822_v25  ;;  %vm2703_vm7 = vmmov %vm2692_vm4 }
 0x214   : > { %1684 = vmatprep.subr.msk.bf16.mxu1 %vm2703_vm7, %v1360_v59  ;;  %vm2704_vm8 = vmmov %vm2694_vm2  ;;  %v1421_v10 = vsel %vm2706_vm3, %v1419_v5, 0.0 }
 0x215   : > { %vm2705_vm0 = vmmov %vm2692_vm4  ;;  %v1423_v12 = vpack.c.bf16 %v1421_v10, %v1421_v10 }
 0x216   : > { %1676 = vmatmul.mubr.msk.bf16.vlgmr.msra.gmra.mxu0 %vm2704_vm8, %v1674_v18  ;;  %v1303_v11 = vsel %vm2705_vm0, %v1295_v63, 0  ;;  %vm2707_vm4 = vmmov %vm2702_vm13 }
 0x217   : > { %1323 = vmatpush1.bf16.msra.mxu0 %v1303_v11  ;;  %1340 = vmatprep.mubr.bf16.mxu0 %v1890_v0  ;;  %v1483_v39 = vsel %vm2707_vm4, %v1826_v58, %v1827_v16  ;;  %vm2708_vm9 = vmmov %vm2705_vm0 }
 0x218   : > { %1687 = vmatprep.subr.msk.bf16.mxu0 %vm2708_vm9, %v1424_v9  ;;  %vm2709_vm14 = vmmov %vm2705_vm0  ;;  %v1485_v37 = vsel %vm2710_vm15, %v1483_v39, 0.0  ;;  %v1547_v9 = vpop.permute.xlu0 %1546 }
 0x219   : > { %1679 = vmatmul.mubr.msk.bf16.vlgmr.msra.gmra.mxu1 %vm2694_vm2, %v1677_v32  ;;  %v1367_v54 = vsel %vm2709_vm14, %v1359_v42, 0  ;;  %vm2711_vm5 = vmmov %vm2705_vm0  ;;  %v1487_v14 = vpack.c.bf16 %v1485_v37, %v1485_v37 }
 0x21a   : > { %1387 = vmatpush1.bf16.msra.mxu1 %v1367_v54  ;;  %1404 = vmatprep.mubr.bf16.mxu1 %v1890_v0  ;;  %vm2712_vm6 = vmmov %vm2694_vm2 }
 0x21b   : > { %1690 = vmatprep.subr.msk.bf16.mxu1 %vm2711_vm5, %v1488_v44  ;;  %vm2713_vm11 = vmmov %vm2705_vm0 }
 0x21c   : > { %v1431_v17 = vsel %vm2713_vm11, %v1423_v12, 0  ;;  %vm2714_vm12 = vmmov %vm2694_vm2 }
 0x21d   : > { %vm2715_vm10 = vmmov %vm2705_vm0 }
 0x21e   : > { %1682 = vmatmul.mubr.msk.bf16.vlgmr.msra.gmra.mxu0 %vm2712_vm6, %v1680_v13  ;;  %v1495_v19 = vsel %vm2715_vm10, %v1487_v14, 0  ;;  %vm2716_vm1 = vmmov %vm2694_vm2 }
 0x21f   : > { %1451 = vmatpush1.bf16.msra.mxu0 %v1431_v17  ;;  %1468 = vmatprep.mubr.bf16.mxu0 %v1890_v0  ;;  %vm2717_vm13 = vmmov %vm2716_vm1 }
 0x221   : > { %1685 = vmatmul.mubr.msk.bf16.vlgmr.msra.gmra.mxu1 %vm2714_vm12, %v1683_v30 }
 0x222   : > { %1515 = vmatpush1.bf16.msra.mxu1 %v1495_v19  ;;  %1532 = vmatprep.mubr.bf16.mxu1 %v1890_v0 }
 0x226   : > { %1688 = vmatmul.mubr.msk.bf16.vlgmr.msra.gmra.mxu0 %vm2716_vm1, %v1686_v29 }
 0x229   : > { %1691 = vmatmul.mubr.msk.bf16.vlgmr.msra.gmra.mxu1 %vm2717_vm13, %v1689_v20 }
 0x2c9   : > { %v1044_v62 = vpop.f32.mrf.mxu1 }
 0x2cb   : > { %v1046_v21 = vpop.f32.mrf.mxu1 }
 0x2cd   : > { %v1048_v49 = vpop.f32.mrf.mxu1 }
 0x2ce   : > { %v1094_v43 = vpop.f32.mrf.mxu0 }
 0x2cf   : > { %v1049_v22 = vpop.f32.mrf.mxu1  ;;  %v1095_v28 = vadd.f32 %v1094_v43, %v1044_v62 }
 0x2d0   : > { %v1096_v23 = vpop.f32.mrf.mxu0 }
 0x2d1   : > { %v1156_v47 = vpop.f32.mrf.mxu1  ;;  %v1097_v34 = vadd.f32 %v1096_v23, %v1046_v21 }
 0x2d2   : > { %v1098_v24 = vpop.f32.mrf.mxu0  ;;  %v1163_v35 = vadd.f32 %v1156_v47, %v1095_v28 }
 0x2d3   : > { %v1158_v26 = vpop.f32.mrf.mxu1 }
 0x2d4   : > { %v1099_v25 = vpop.f32.mrf.mxu0  ;;  %v1164_v38 = vadd.f32 %v1158_v26, %v1097_v34 }
 0x2d5   : > { %v1160_v15 = vpop.f32.mrf.mxu1 }
 0x2d6   : > { %v1220_v0 = vpop.f32.mrf.mxu0 }
 0x2d7   : > { %v1161_v27 = vpop.f32.mrf.mxu1  ;;  %v1227_v45 = vadd.f32 %v1220_v0, %v1163_v35 }
 0x2d8   : > { %v1222_v31 = vpop.f32.mrf.mxu0 }
 0x2d9   : > { %v1278_v40 = vpop.f32.mrf.mxu1  ;;  %v1228_v51 = vadd.f32 %v1222_v31, %v1164_v38 }
 0x2da   : > { %v1224_v61 = vpop.f32.mrf.mxu0  ;;  %v1285_v55 = vadd.f32 %v1278_v40, %v1227_v45 }
 0x2db   : > { %v1280_v7 = vpop.f32.mrf.mxu1 }
 0x2dc   : > { %v1225_v53 = vpop.f32.mrf.mxu0  ;;  %v1286_v8 = vadd.f32 %v1280_v7, %v1228_v51 }
 0x2dd   : > { %v1282_v33 = vpop.f32.mrf.mxu1 }
 0x2de   : > { %v1342_v46 = vpop.f32.mrf.mxu0 }
 0x2df   : > { %v1283_v41 = vpop.f32.mrf.mxu1  ;;  %v1349_v16 = vadd.f32 %v1342_v46, %v1285_v55 }
 0x2e0   : > { %v1344_v52 = vpop.f32.mrf.mxu0 }
 0x2e1   : > { %v1406_v50 = vpop.f32.mrf.mxu1  ;;  %v1350_v60 = vadd.f32 %v1344_v52, %v1286_v8 }
 0x2e2   : > { %v1346_v48 = vpop.f32.mrf.mxu0  ;;  %v1413_v63 = vadd.f32 %v1406_v50, %v1349_v16 }
 0x2e3   : > { %v1408_v57 = vpop.f32.mrf.mxu1 }
 0x2e4   : > { %v1347_v56 = vpop.f32.mrf.mxu0  ;;  %v1414_v4 = vadd.f32 %v1408_v57, %v1350_v60 }
 0x2e5   : > { %v1410_v58 = vpop.f32.mrf.mxu1 }
 0x2e6   : > { %v1470_v59 = vpop.f32.mrf.mxu0 }
 0x2e7   : > { %v1411_v1 = vpop.f32.mrf.mxu1  ;;  %v1477_v5 = vadd.f32 %v1470_v59, %v1413_v63 }
 0x2e8   : > { %v1472_v18 = vpop.f32.mrf.mxu0 }
 0x2e9   : > { %v1534_v6 = vpop.f32.mrf.mxu1  ;;  %v1478_v42 = vadd.f32 %v1472_v18, %v1414_v4 }
 0x2ea   : > { %v1474_v11 = vpop.f32.mrf.mxu0  ;;  %v1541_v36 = vadd.f32 %v1534_v6, %v1477_v5 }
 0x2eb   : > { %v1536_v32 = vpop.f32.mrf.mxu1 }
 0x2ec   : > { %v1475_v10 = vpop.f32.mrf.mxu0  ;;  %v1549_v39 = vadd.f32 %v1547_v9, %v1541_v36  ;;  %v1542_v44 = vadd.f32 %v1536_v32, %v1478_v42 }
 0x2ed   : > { %v1538_v54 = vpop.f32.mrf.mxu1 }
 0x2ee   : > { %v1550_v12 = vadd.f32 %v1547_v9, %v1542_v44  ;;  %v1551_v37 = vadd.f32 %v1549_v39, %v1991_v2 }
 0x2ef   : > { %v1539_v13 = vpop.f32.mrf.mxu1 }
 0x2f0   : > { %v1552_v17 = vadd.f32 %v1550_v12, %v1995_v3 }
 0x2f2   : > { %v1555_v14 = vcombine.low %v1551_v37, %v1552_v17 }
 0x2f4   : > { %1557 = vst [vmem:[%s244_s20] sm:$0xff] %v1555_v14 }
 0x2f5   : > { %1841 = shalt.err (!%p1838_p3)
}
 0x2f6   : > { %s1842_s14 = scalar_lea.hbm %s1571_s28, 128  ;;  %s1846_s17 = scalar_lea.hbm %s2568_s6, 256 }
 0x2f7   : > { %p1843_p4 = scmp.ne.s32.totalorder %s1571_s28, %s1842_s14  ;;  %p1847_p9 = scmp.lt.s32.totalorder %s1571_s28, %s2568_s6 }
 0x2f8   : > { %p1848_p10 = scmp.lt.s32.totalorder %s1846_s17, %s1842_s14 }
 0x2f9   : > { %p1844_p7 = pnand %p1843_p4, %p1973_p5 }
 0x2fa   : > { %p1849_p11 = por %p1848_p10, %p1847_p9 }
 0x2fb   : > { %p1845_p8 = pneg %p1844_p7 }
 0x2fd   : > { %p1850_p12 = pnand %p1849_p11, %p1845_p8 }
 0x2ff   : > { %1853 = shalt.err (!%p1850_p12)
}
 0x300   : > { %1699 = dma.vmem_to_hbm [thread:$0]  (%p1973_p5), %s1574_s26, 128, %s1571_s28, %s1559_s29  }
 0x301 PF: > { %p1705_p13 = scmp.ge.s32.totalorder %s1888_s24, 2  ;;  %s1585_s20 = sand.u32 1, %s1876_s21  }
 0x302   : > { %s1586_s12 = scalar_lea.sflag [#allocation3], %s1585_s20 }
 0x303   : > { %p1702_p0 = pnand %p1705_p13, %p1977_p6 }
 0x305   : > { %p1703_p1 = pneg %p1702_p0 }
 0x307   : > { %1871 = dma.done.wait (%p1703_p1), %s1586_s12, 128  }
 0x308   : > { %1873 = vsyncadd (%p1703_p1), %s1586_s12, 4294967168  ;;  %p16_p2 = scmp.ge.s32.totalorder %s1960_s27, 4   ;;  %s2718_s21 = smov %s1880_s22 }
 0x309   : > { %s2719_s22 = smov %s1884_s23  ;;  %s2720_s23 = smov %s1971_s30 }
 0x30a   : > { %s2721_s24 = smov %s1960_s27  ;;  %18 = sbr.rel (!%p16_p2) target bundleno = 3 (0x3), region = 96 }
 0x30f   :  { %1591 = vsyncpa [#allocation3], 1 }
 0x310   :  { %1593 = vsyncpa [#allocation3 + $0x1], 1 }

</bundles_post_ra>
